<compile_context>
chip_gen: v7x
topology: tpu7x:2x2x1
jax: 0.10.0
libtpu: 0.0.40
codegen_flags: <defaults>
</compile_context>

<pallas_src>
import functools

import jax
import jax.numpy as jnp
from jax.experimental import pallas as pl
from jax.experimental.pallas import tpu as pltpu


def _round_up(v, m):
    return ((v + m - 1) // m) * m


def _pad2d(a, rows, cols):
    pr, pc = rows - a.shape[0], cols - a.shape[1]
    if pr == 0 and pc == 0:          # skip zero-width pads (no extra XLA op)
        return a
    return jnp.pad(a, ((0, pr), (0, pc)))


# ----------------------------- Pallas kernel --------------------------------

def _gcn_deformer_kernel(adj_ref, x_ref,
                         w_in_ref, b_in_ref,
                         w1_ref, b1_ref, w2_ref, b2_ref,
                         w_out_ref, b_out_ref,
                         out_ref, *, num_blocks, compute_dtype):
    """Entire GCNDeformer forward on VMEM-resident operands (single program)."""
    adj = adj_ref[...]               # already bf16 (pre-cast in the wrapper)

    def gcn_layer(h, w, b, residual=None, relu=True):
        # GCNConv: Â @ (h @ W) + b   (MXU matmuls, bf16 operands, f32 accumulate)
        h_c = h if h.dtype == compute_dtype else h.astype(compute_dtype)
        xw = jnp.dot(h_c, w, preferred_element_type=jnp.float32)
        y = jnp.dot(adj, xw.astype(compute_dtype),
                    preferred_element_type=jnp.float32)
        y = y + b                     # f32 bias add
        if residual is not None:      # trace-time branch: no zero-residual input
            y = y + residual
        return jnp.maximum(y, 0.0) if relu else y

    # input_proj + ReLU
    h = gcn_layer(x_ref[...], w_in_ref[...], b_in_ref[...], relu=True)

    # GResBlocks: h = relu(conv2(relu(conv1(h))) + h)   (statically unrolled)
    for i in range(num_blocks):
        out = gcn_layer(h, w1_ref[i], b1_ref[i], relu=True)
        h = gcn_layer(out, w2_ref[i], b2_ref[i], residual=h, relu=True)

    # output_proj (no activation)
    y = gcn_layer(h, w_out_ref[...], b_out_ref[...], relu=False)
    out_ref[...] = y.astype(out_ref.dtype)


# --------------------------- one-time param prep ------------------------------

def prepare_params(params, compute_dtype=jnp.bfloat16):
    """Hoisted out of the per-call path: pad every channel dim to a multiple of
    128, stack the block weights, and pre-cast matmul operands to bf16.  Biases
    stay f32 as [1, C] (the add is done in f32)."""
    in_dim, hidden = params["input_proj"]["w"].shape
    out_dim = params["output_proj"]["w"].shape[1]
    in_p, hid_p, out_p = (_round_up(d, 128) for d in (in_dim, hidden, out_dim))

    def w(p, r, c):
        return _pad2d(p, r, c).astype(compute_dtype)

    def b(p, c):
        pad = c - p.shape[0]
        p = p if pad == 0 else jnp.pad(p, (0, pad))
        return p[None, :].astype(jnp.float32)

    blocks = params["blocks"]
    return {
        "w_in": w(params["input_proj"]["w"], in_p, hid_p),
        "b_in": b(params["input_proj"]["b"], hid_p),
        "w1": jnp.stack([w(blk["conv1"]["w"], hid_p, hid_p) for blk in blocks]),
        "b1": jnp.stack([b(blk["conv1"]["b"], hid_p) for blk in blocks]),
        "w2": jnp.stack([w(blk["conv2"]["w"], hid_p, hid_p) for blk in blocks]),
        "b2": jnp.stack([b(blk["conv2"]["b"], hid_p) for blk in blocks]),
        "w_out": w(params["output_proj"]["w"], hid_p, out_p),
        "b_out": b(params["output_proj"]["b"], out_p),
    }


# ------------------------------ forward wrapper --------------------------------

def gcn_deformer_forward(prep, x, adj_p, *, out_dim, compute_dtype=jnp.bfloat16):
    """Fused GCNDeformer forward.

    prep  : output of prepare_params (padded, bf16 weights / f32 biases)
    x     : [N, in_dim] f32 node features (padded + cast per call, cheap)
    adj_p : [N_p, N_p] bf16 normalized adjacency, already lane-padded
    """
    n, _ = x.shape
    n_p = adj_p.shape[0]
    in_p, hid_p = prep["w_in"].shape
    out_p = prep["w_out"].shape[1]
    num_blocks = prep["w1"].shape[0]

    x_p = _pad2d(x, n_p, in_p).astype(compute_dtype)

    # Advisory cost estimate (lets XLA schedule the pads / adjacency build
    # around the custom call instead of serializing).
    nb = num_blocks
    mm_flops = 2 * n_p * (in_p * hid_p + 2 * nb * hid_p * hid_p + hid_p * out_p)
    agg_flops = 2 * n_p * n_p * (hid_p * (2 * nb + 1) + out_p)
    bytes_in = (adj_p.size * adj_p.dtype.itemsize
                + x_p.size * x_p.dtype.itemsize
                + sum(v.size * v.dtype.itemsize for v in prep.values()))
    bytes_out = n_p * out_p * 4
    cost = pl.CostEstimate(flops=mm_flops + agg_flops, transcendentals=0,
                           bytes_accessed=bytes_in + bytes_out)

    # Explicit VMEM budget: resident bf16 Â + x + weights + ~4 live f32
    # [N_p, hid_p] temporaries (h, residual, xw, y) + f32 output, x2 headroom,
    # clamped to v7x's 64 MiB physical VMEM.
    resident = bytes_in + bytes_out + 4 * 4 * n_p * hid_p
    vmem_limit = int(min(64 * 1024 * 1024, max(2 * resident, 4 * 1024 * 1024)))

    kernel = functools.partial(_gcn_deformer_kernel,
                               num_blocks=num_blocks, compute_dtype=compute_dtype)
    vmem = pl.BlockSpec(memory_space=pltpu.MemorySpace.VMEM)
    out = pl.pallas_call(
        kernel,
        out_shape=jax.ShapeDtypeStruct((n_p, out_p), jnp.float32),
        in_specs=[vmem] * 10,
        out_specs=vmem,
        compiler_params=pltpu.CompilerParams(vmem_limit_bytes=vmem_limit),
        cost_estimate=cost,
    )(adj_p, x_p, prep["w_in"], prep["b_in"], prep["w1"], prep["b1"],
      prep["w2"], prep["b2"], prep["w_out"], prep["b_out"])
    # Only [:n, :out_dim] is meaningful; at this size the slice is negligible.
    return out[:n, :out_dim]


# ------------------------------ JAX glue --------------------------------------

def normalized_adjacency(edge_index, num_nodes, num_nodes_padded=None,
                         compute_dtype=jnp.bfloat16):
    """Dense Â = D^{-1/2}(A + I)D^{-1/2} (torch_geometric gcn_norm on the raw
    edge_index with unit edge weights), built directly at the lane-padded size
    so the wrapper never re-pads the NxN matrix.  Padded rows/cols stay zero
    (disconnected nodes), and the result is cast to bf16 once."""
    n_p = num_nodes if num_nodes_padded is None else num_nodes_padded
    src, dst = edge_index[0], edge_index[1]
    loop = jnp.arange(num_nodes, dtype=src.dtype)
    src = jnp.concatenate([src, loop])
    dst = jnp.concatenate([dst, loop])
    a = jnp.zeros((n_p, n_p), jnp.float32).at[dst, src].add(1.0)
    deg = a.sum(axis=1)
    d_inv_sqrt = jnp.where(deg > 0, 1.0 / jnp.sqrt(deg), 0.0)
    return (d_inv_sqrt[:, None] * a * d_inv_sqrt[None, :]).astype(compute_dtype)


def _glorot(key, fan_in, fan_out):
    limit = jnp.sqrt(6.0 / (fan_in + fan_out))
    return jax.random.uniform(key, (fan_in, fan_out), jnp.float32, -limit, limit)


def init_params(key, in_dim, hidden_dim, out_dim, num_blocks):
    keys = jax.random.split(key, 2 + 2 * num_blocks)
    params = {
        "input_proj": {"w": _glorot(keys[0], in_dim, hidden_dim),
                       "b": jnp.zeros((hidden_dim,), jnp.float32)},
        "blocks": [],
        "output_proj": {"w": _glorot(keys[1], hidden_dim, out_dim),
                        "b": jnp.zeros((out_dim,), jnp.float32)},
    }
    for i in range(num_blocks):
        params["blocks"].append({
            "conv1": {"w": _glorot(keys[2 + 2 * i], hidden_dim, hidden_dim),
                      "b": jnp.zeros((hidden_dim,), jnp.float32)},
            "conv2": {"w": _glorot(keys[3 + 2 * i], hidden_dim, hidden_dim),
                      "b": jnp.zeros((hidden_dim,), jnp.float32)},
        })
    return params


def gcn_deformer_reference(params, x, adj, compute_dtype=jnp.bfloat16):
    """Pure-JAX reference with the same bf16-in / f32-accumulate matmul policy."""
    adj = adj.astype(compute_dtype)

    def layer(h, w, b, residual=None, relu=True):
        xw = jnp.dot(h.astype(compute_dtype), w.astype(compute_dtype),
                     preferred_element_type=jnp.float32)
        y = jnp.dot(adj, xw.astype(compute_dtype),
                    preferred_element_type=jnp.float32) + b
        if residual is not None:
            y = y + residual
        return jnp.maximum(y, 0.0) if relu else y

    h = layer(x, params["input_proj"]["w"], params["input_proj"]["b"])
    for blk in params["blocks"]:
        out = layer(h, blk["conv1"]["w"], blk["conv1"]["b"])
        h = layer(out, blk["conv2"]["w"], blk["conv2"]["b"], residual=h)
    return layer(h, params["output_proj"]["w"], params["output_proj"]["b"], relu=False)


# ------------------------------- main -----------------------------------------

if __name__ == "__main__":
    N, IN_DIM, HIDDEN_DIM, OUT_DIM, NUM_BLOCKS = 128, 64, 128, 3, 3
    E = 256  # directed edges before symmetrization

    key = jax.random.PRNGKey(0)
    k_x, k_src, k_dst, k_params = jax.random.split(key, 4)

    x = jax.random.normal(k_x, (N, IN_DIM), jnp.float32)
    src = jax.random.randint(k_src, (E,), 0, N, dtype=jnp.int32)
    dst = jax.random.randint(k_dst, (E,), 0, N, dtype=jnp.int32)
    # symmetric edge_index, shape (2, 2E)
    edge_index = jnp.stack([jnp.concatenate([src, dst]),
                            jnp.concatenate([dst, src])])

    n_p = _round_up(N, 128)
    adj_p = normalized_adjacency(edge_index, N, n_p)   # bf16, built padded once
    params = init_params(k_params, IN_DIM, HIDDEN_DIM, OUT_DIM, NUM_BLOCKS)
    prep = prepare_params(params)                      # one-time param prep

    fwd = jax.jit(functools.partial(gcn_deformer_forward, out_dim=OUT_DIM))
    out = fwd(prep, x, adj_p)
    jax.block_until_ready(out)

    assert out.shape == (N, OUT_DIM) and out.dtype == jnp.float32

    ref = gcn_deformer_reference(params, x, adj_p[:N, :N])
    max_err = float(jnp.max(jnp.abs(out - ref)))
    assert jnp.allclose(out, ref, atol=2e-2, rtol=2e-2), max_err

    print("KERNEL_OK")
</pallas_src>

<mosaic_0001>
module attributes {stable_mosaic.version = 11 : i64} {
  func.func @_gcn_deformer_kernel(%arg0: memref<128x128xbf16, #tpu.memory_space<vmem>>, %arg1: memref<128x128xbf16, #tpu.memory_space<vmem>>, %arg2: memref<128x128xbf16, #tpu.memory_space<vmem>>, %arg3: memref<1x128xf32, #tpu.memory_space<vmem>>, %arg4: memref<3x128x128xbf16, #tpu.memory_space<vmem>>, %arg5: memref<3x1x128xf32, #tpu.memory_space<vmem>>, %arg6: memref<3x128x128xbf16, #tpu.memory_space<vmem>>, %arg7: memref<3x1x128xf32, #tpu.memory_space<vmem>>, %arg8: memref<128x128xbf16, #tpu.memory_space<vmem>>, %arg9: memref<1x128xf32, #tpu.memory_space<vmem>>, %arg10: memref<128x128xf32, #tpu.memory_space<vmem>>) attributes {dimension_semantics = [], scalar_prefetch = 0 : i64, scratch_operands = 0 : i64, tpu.core_type = #tpu.core_type<tc>} {
    %c0 = arith.constant 0 : index
    %c0_0 = arith.constant 0 : index
    %0 = vector.load %arg0[%c0, %c0_0] : memref<128x128xbf16, #tpu.memory_space<vmem>>, vector<128x128xbf16>
    %c0_1 = arith.constant 0 : index
    %c0_2 = arith.constant 0 : index
    %1 = vector.load %arg1[%c0_1, %c0_2] : memref<128x128xbf16, #tpu.memory_space<vmem>>, vector<128x128xbf16>
    %c0_3 = arith.constant 0 : index
    %c0_4 = arith.constant 0 : index
    %2 = vector.load %arg2[%c0_3, %c0_4] : memref<128x128xbf16, #tpu.memory_space<vmem>>, vector<128x128xbf16>
    %c0_5 = arith.constant 0 : index
    %c0_6 = arith.constant 0 : index
    %3 = vector.load %arg3[%c0_5, %c0_6] : memref<1x128xf32, #tpu.memory_space<vmem>>, vector<1x128xf32>
    %cst = arith.constant dense<0.000000e+00> : vector<128x128xf32>
    %4 = tpu.matmul %1, %2, %cst {dimension_numbers = #tpu.dot_dimension_numbers<[1], [0], [0], [1], [0, 0, 1, 1], [], []>} : vector<128x128xbf16>, vector<128x128xbf16>, vector<128x128xf32> -> vector<128x128xf32>
    %5 = arith.truncf %4 : vector<128x128xf32> to vector<128x128xbf16>
    %cst_7 = arith.constant dense<0.000000e+00> : vector<128x128xf32>
    %6 = tpu.matmul %0, %5, %cst_7 {dimension_numbers = #tpu.dot_dimension_numbers<[1], [0], [0], [1], [0, 0, 1, 1], [], []>} : vector<128x128xbf16>, vector<128x128xbf16>, vector<128x128xf32> -> vector<128x128xf32>
    %7 = vector.broadcast %3 : vector<1x128xf32> to vector<128x128xf32>
    %8 = arith.addf %6, %7 : vector<128x128xf32>
    %cst_8 = arith.constant 0.000000e+00 : f32
    %9 = vector.broadcast %cst_8 : f32 to vector<128x128xf32>
    %10 = arith.maximumf %8, %9 : vector<128x128xf32>
    %c0_9 = arith.constant 0 : index
    %c0_10 = arith.constant 0 : index
    %c0_11 = arith.constant 0 : index
    %11 = vector.load %arg4[%c0_9, %c0_10, %c0_11] : memref<3x128x128xbf16, #tpu.memory_space<vmem>>, vector<1x128x128xbf16>
    %12 = vector.shape_cast %11 : vector<1x128x128xbf16> to vector<128x128xbf16>
    %c0_12 = arith.constant 0 : index
    %c0_13 = arith.constant 0 : index
    %c0_14 = arith.constant 0 : index
    %13 = vector.load %arg5[%c0_12, %c0_13, %c0_14] : memref<3x1x128xf32, #tpu.memory_space<vmem>>, vector<1x1x128xf32>
    %14 = vector.shape_cast %13 : vector<1x1x128xf32> to vector<1x128xf32>
    %15 = arith.truncf %10 : vector<128x128xf32> to vector<128x128xbf16>
    %cst_15 = arith.constant dense<0.000000e+00> : vector<128x128xf32>
    %16 = tpu.matmul %15, %12, %cst_15 {dimension_numbers = #tpu.dot_dimension_numbers<[1], [0], [0], [1], [0, 0, 1, 1], [], []>} : vector<128x128xbf16>, vector<128x128xbf16>, vector<128x128xf32> -> vector<128x128xf32>
    %17 = arith.truncf %16 : vector<128x128xf32> to vector<128x128xbf16>
    %cst_16 = arith.constant dense<0.000000e+00> : vector<128x128xf32>
    %18 = tpu.matmul %0, %17, %cst_16 {dimension_numbers = #tpu.dot_dimension_numbers<[1], [0], [0], [1], [0, 0, 1, 1], [], []>} : vector<128x128xbf16>, vector<128x128xbf16>, vector<128x128xf32> -> vector<128x128xf32>
    %19 = vector.broadcast %14 : vector<1x128xf32> to vector<128x128xf32>
    %20 = arith.addf %18, %19 : vector<128x128xf32>
    %cst_17 = arith.constant 0.000000e+00 : f32
    %21 = vector.broadcast %cst_17 : f32 to vector<128x128xf32>
    %22 = arith.maximumf %20, %21 : vector<128x128xf32>
    %c0_18 = arith.constant 0 : index
    %c0_19 = arith.constant 0 : index
    %c0_20 = arith.constant 0 : index
    %23 = vector.load %arg6[%c0_18, %c0_19, %c0_20] : memref<3x128x128xbf16, #tpu.memory_space<vmem>>, vector<1x128x128xbf16>
    %24 = vector.shape_cast %23 : vector<1x128x128xbf16> to vector<128x128xbf16>
    %c0_21 = arith.constant 0 : index
    %c0_22 = arith.constant 0 : index
    %c0_23 = arith.constant 0 : index
    %25 = vector.load %arg7[%c0_21, %c0_22, %c0_23] : memref<3x1x128xf32, #tpu.memory_space<vmem>>, vector<1x1x128xf32>
    %26 = vector.shape_cast %25 : vector<1x1x128xf32> to vector<1x128xf32>
    %27 = arith.truncf %22 : vector<128x128xf32> to vector<128x128xbf16>
    %cst_24 = arith.constant dense<0.000000e+00> : vector<128x128xf32>
    %28 = tpu.matmul %27, %24, %cst_24 {dimension_numbers = #tpu.dot_dimension_numbers<[1], [0], [0], [1], [0, 0, 1, 1], [], []>} : vector<128x128xbf16>, vector<128x128xbf16>, vector<128x128xf32> -> vector<128x128xf32>
    %29 = arith.truncf %28 : vector<128x128xf32> to vector<128x128xbf16>
    %cst_25 = arith.constant dense<0.000000e+00> : vector<128x128xf32>
    %30 = tpu.matmul %0, %29, %cst_25 {dimension_numbers = #tpu.dot_dimension_numbers<[1], [0], [0], [1], [0, 0, 1, 1], [], []>} : vector<128x128xbf16>, vector<128x128xbf16>, vector<128x128xf32> -> vector<128x128xf32>
    %31 = vector.broadcast %26 : vector<1x128xf32> to vector<128x128xf32>
    %32 = arith.addf %30, %31 : vector<128x128xf32>
    %33 = arith.addf %32, %10 : vector<128x128xf32>
    %cst_26 = arith.constant 0.000000e+00 : f32
    %34 = vector.broadcast %cst_26 : f32 to vector<128x128xf32>
    %35 = arith.maximumf %33, %34 : vector<128x128xf32>
    %c1 = arith.constant 1 : index
    %c0_27 = arith.constant 0 : index
    %c0_28 = arith.constant 0 : index
    %36 = vector.load %arg4[%c1, %c0_27, %c0_28] : memref<3x128x128xbf16, #tpu.memory_space<vmem>>, vector<1x128x128xbf16>
    %37 = vector.shape_cast %36 : vector<1x128x128xbf16> to vector<128x128xbf16>
    %c1_29 = arith.constant 1 : index
    %c0_30 = arith.constant 0 : index
    %c0_31 = arith.constant 0 : index
    %38 = vector.load %arg5[%c1_29, %c0_30, %c0_31] : memref<3x1x128xf32, #tpu.memory_space<vmem>>, vector<1x1x128xf32>
    %39 = vector.shape_cast %38 : vector<1x1x128xf32> to vector<1x128xf32>
    %40 = arith.truncf %35 : vector<128x128xf32> to vector<128x128xbf16>
    %cst_32 = arith.constant dense<0.000000e+00> : vector<128x128xf32>
    %41 = tpu.matmul %40, %37, %cst_32 {dimension_numbers = #tpu.dot_dimension_numbers<[1], [0], [0], [1], [0, 0, 1, 1], [], []>} : vector<128x128xbf16>, vector<128x128xbf16>, vector<128x128xf32> -> vector<128x128xf32>
    %42 = arith.truncf %41 : vector<128x128xf32> to vector<128x128xbf16>
    %cst_33 = arith.constant dense<0.000000e+00> : vector<128x128xf32>
    %43 = tpu.matmul %0, %42, %cst_33 {dimension_numbers = #tpu.dot_dimension_numbers<[1], [0], [0], [1], [0, 0, 1, 1], [], []>} : vector<128x128xbf16>, vector<128x128xbf16>, vector<128x128xf32> -> vector<128x128xf32>
    %44 = vector.broadcast %39 : vector<1x128xf32> to vector<128x128xf32>
    %45 = arith.addf %43, %44 : vector<128x128xf32>
    %cst_34 = arith.constant 0.000000e+00 : f32
    %46 = vector.broadcast %cst_34 : f32 to vector<128x128xf32>
    %47 = arith.maximumf %45, %46 : vector<128x128xf32>
    %c1_35 = arith.constant 1 : index
    %c0_36 = arith.constant 0 : index
    %c0_37 = arith.constant 0 : index
    %48 = vector.load %arg6[%c1_35, %c0_36, %c0_37] : memref<3x128x128xbf16, #tpu.memory_space<vmem>>, vector<1x128x128xbf16>
    %49 = vector.shape_cast %48 : vector<1x128x128xbf16> to vector<128x128xbf16>
    %c1_38 = arith.constant 1 : index
    %c0_39 = arith.constant 0 : index
    %c0_40 = arith.constant 0 : index
    %50 = vector.load %arg7[%c1_38, %c0_39, %c0_40] : memref<3x1x128xf32, #tpu.memory_space<vmem>>, vector<1x1x128xf32>
    %51 = vector.shape_cast %50 : vector<1x1x128xf32> to vector<1x128xf32>
    %52 = arith.truncf %47 : vector<128x128xf32> to vector<128x128xbf16>
    %cst_41 = arith.constant dense<0.000000e+00> : vector<128x128xf32>
    %53 = tpu.matmul %52, %49, %cst_41 {dimension_numbers = #tpu.dot_dimension_numbers<[1], [0], [0], [1], [0, 0, 1, 1], [], []>} : vector<128x128xbf16>, vector<128x128xbf16>, vector<128x128xf32> -> vector<128x128xf32>
    %54 = arith.truncf %53 : vector<128x128xf32> to vector<128x128xbf16>
    %cst_42 = arith.constant dense<0.000000e+00> : vector<128x128xf32>
    %55 = tpu.matmul %0, %54, %cst_42 {dimension_numbers = #tpu.dot_dimension_numbers<[1], [0], [0], [1], [0, 0, 1, 1], [], []>} : vector<128x128xbf16>, vector<128x128xbf16>, vector<128x128xf32> -> vector<128x128xf32>
    %56 = vector.broadcast %51 : vector<1x128xf32> to vector<128x128xf32>
    %57 = arith.addf %55, %56 : vector<128x128xf32>
    %58 = arith.addf %57, %35 : vector<128x128xf32>
    %cst_43 = arith.constant 0.000000e+00 : f32
    %59 = vector.broadcast %cst_43 : f32 to vector<128x128xf32>
    %60 = arith.maximumf %58, %59 : vector<128x128xf32>
    %c2 = arith.constant 2 : index
    %c0_44 = arith.constant 0 : index
    %c0_45 = arith.constant 0 : index
    %61 = vector.load %arg4[%c2, %c0_44, %c0_45] : memref<3x128x128xbf16, #tpu.memory_space<vmem>>, vector<1x128x128xbf16>
    %62 = vector.shape_cast %61 : vector<1x128x128xbf16> to vector<128x128xbf16>
    %c2_46 = arith.constant 2 : index
    %c0_47 = arith.constant 0 : index
    %c0_48 = arith.constant 0 : index
    %63 = vector.load %arg5[%c2_46, %c0_47, %c0_48] : memref<3x1x128xf32, #tpu.memory_space<vmem>>, vector<1x1x128xf32>
    %64 = vector.shape_cast %63 : vector<1x1x128xf32> to vector<1x128xf32>
    %65 = arith.truncf %60 : vector<128x128xf32> to vector<128x128xbf16>
    %cst_49 = arith.constant dense<0.000000e+00> : vector<128x128xf32>
    %66 = tpu.matmul %65, %62, %cst_49 {dimension_numbers = #tpu.dot_dimension_numbers<[1], [0], [0], [1], [0, 0, 1, 1], [], []>} : vector<128x128xbf16>, vector<128x128xbf16>, vector<128x128xf32> -> vector<128x128xf32>
    %67 = arith.truncf %66 : vector<128x128xf32> to vector<128x128xbf16>
    %cst_50 = arith.constant dense<0.000000e+00> : vector<128x128xf32>
    %68 = tpu.matmul %0, %67, %cst_50 {dimension_numbers = #tpu.dot_dimension_numbers<[1], [0], [0], [1], [0, 0, 1, 1], [], []>} : vector<128x128xbf16>, vector<128x128xbf16>, vector<128x128xf32> -> vector<128x128xf32>
    %69 = vector.broadcast %64 : vector<1x128xf32> to vector<128x128xf32>
    %70 = arith.addf %68, %69 : vector<128x128xf32>
    %cst_51 = arith.constant 0.000000e+00 : f32
    %71 = vector.broadcast %cst_51 : f32 to vector<128x128xf32>
    %72 = arith.maximumf %70, %71 : vector<128x128xf32>
    %c2_52 = arith.constant 2 : index
    %c0_53 = arith.constant 0 : index
    %c0_54 = arith.constant 0 : index
    %73 = vector.load %arg6[%c2_52, %c0_53, %c0_54] : memref<3x128x128xbf16, #tpu.memory_space<vmem>>, vector<1x128x128xbf16>
    %74 = vector.shape_cast %73 : vector<1x128x128xbf16> to vector<128x128xbf16>
    %c2_55 = arith.constant 2 : index
    %c0_56 = arith.constant 0 : index
    %c0_57 = arith.constant 0 : index
    %75 = vector.load %arg7[%c2_55, %c0_56, %c0_57] : memref<3x1x128xf32, #tpu.memory_space<vmem>>, vector<1x1x128xf32>
    %76 = vector.shape_cast %75 : vector<1x1x128xf32> to vector<1x128xf32>
    %77 = arith.truncf %72 : vector<128x128xf32> to vector<128x128xbf16>
    %cst_58 = arith.constant dense<0.000000e+00> : vector<128x128xf32>
    %78 = tpu.matmul %77, %74, %cst_58 {dimension_numbers = #tpu.dot_dimension_numbers<[1], [0], [0], [1], [0, 0, 1, 1], [], []>} : vector<128x128xbf16>, vector<128x128xbf16>, vector<128x128xf32> -> vector<128x128xf32>
    %79 = arith.truncf %78 : vector<128x128xf32> to vector<128x128xbf16>
    %cst_59 = arith.constant dense<0.000000e+00> : vector<128x128xf32>
    %80 = tpu.matmul %0, %79, %cst_59 {dimension_numbers = #tpu.dot_dimension_numbers<[1], [0], [0], [1], [0, 0, 1, 1], [], []>} : vector<128x128xbf16>, vector<128x128xbf16>, vector<128x128xf32> -> vector<128x128xf32>
    %81 = vector.broadcast %76 : vector<1x128xf32> to vector<128x128xf32>
    %82 = arith.addf %80, %81 : vector<128x128xf32>
    %83 = arith.addf %82, %60 : vector<128x128xf32>
    %cst_60 = arith.constant 0.000000e+00 : f32
    %84 = vector.broadcast %cst_60 : f32 to vector<128x128xf32>
    %85 = arith.maximumf %83, %84 : vector<128x128xf32>
    %c0_61 = arith.constant 0 : index
    %c0_62 = arith.constant 0 : index
    %86 = vector.load %arg8[%c0_61, %c0_62] : memref<128x128xbf16, #tpu.memory_space<vmem>>, vector<128x128xbf16>
    %c0_63 = arith.constant 0 : index
    %c0_64 = arith.constant 0 : index
    %87 = vector.load %arg9[%c0_63, %c0_64] : memref<1x128xf32, #tpu.memory_space<vmem>>, vector<1x128xf32>
    %88 = arith.truncf %85 : vector<128x128xf32> to vector<128x128xbf16>
    %cst_65 = arith.constant dense<0.000000e+00> : vector<128x128xf32>
    %89 = tpu.matmul %88, %86, %cst_65 {dimension_numbers = #tpu.dot_dimension_numbers<[1], [0], [0], [1], [0, 0, 1, 1], [], []>} : vector<128x128xbf16>, vector<128x128xbf16>, vector<128x128xf32> -> vector<128x128xf32>
    %90 = arith.truncf %89 : vector<128x128xf32> to vector<128x128xbf16>
    %cst_66 = arith.constant dense<0.000000e+00> : vector<128x128xf32>
    %91 = tpu.matmul %0, %90, %cst_66 {dimension_numbers = #tpu.dot_dimension_numbers<[1], [0], [0], [1], [0, 0, 1, 1], [], []>} : vector<128x128xbf16>, vector<128x128xbf16>, vector<128x128xf32> -> vector<128x128xf32>
    %92 = vector.broadcast %87 : vector<1x128xf32> to vector<128x128xf32>
    %93 = arith.addf %91, %92 : vector<128x128xf32>
    %c0_67 = arith.constant 0 : index
    %c0_68 = arith.constant 0 : index
    %94 = vector.load %arg10[%c0_67, %c0_68] : memref<128x128xf32, #tpu.memory_space<vmem>>, vector<128x128xf32>
    tpu.vector_store %arg10[%c0_67, %c0_68], %93 {strides = array<i32>} : memref<128x128xf32, #tpu.memory_space<vmem>>, vector<128x128xf32>,
    return
  }
}

</mosaic_0001>

<bundles_post_ra>
// kernel: gcn_deformer_forward.1
= control target key start
LH: loop header
LB: loop body
LE: loop exit
PB: predicated region body
PF: predicated region fallthrough
CT: control target
= control target key end

     0   :  { %15 = vsyncpa [#allocation3], 0  ;;  %s4463_s0 = inlined_call_operand.vmem [shape: bf16[128,128], index: 0, kind: input, shape index: {}]   ;;  %s4464_s1 = inlined_call_operand.vmem [shape: bf16[128,128], index: 1, kind: input, shape index: {}]   ;;  %s4465_s2 = inlined_call_operand.vmem [shape: bf16[128,128], index: 2, kind: input, shape index: {}]   ;;  %s4466_s3 = inlined_call_operand.vmem [shape: f32[1,128], index: 3, kind: input, shape index: {}]   ;;  %s4467_s4 = inlined_call_operand.vmem [shape: bf16[3,128,128], index: 4, kind: input, shape index: {}]   ;;  %s4468_s5 = inlined_call_operand.vmem [shape: f32[3,1,128], index: 5, kind: input, shape index: {}]   ;;  %s4469_s6 = inlined_call_operand.hbm [shape: bf16[3,128,128], index: 6, kind: input, shape index: {}]   ;;  %s4470_s7 = inlined_call_operand.vmem [shape: f32[3,1,128], index: 7, kind: input, shape index: {}]   ;;  %s4471_s8 = inlined_call_operand.hbm [shape: bf16[128,128], index: 8, kind: input, shape index: {}]   ;;  %s4472_s9 = inlined_call_operand.vmem [shape: f32[1,128], index: 9, kind: input, shape index: {}]   ;;  %s4473_s10 = inlined_call_operand.vmem [shape: f32[128,128], index: 10, kind: output, shape index: {}]  }
   0x1   :  { %16 = vsyncpa [#allocation5], 0  ;;  %s3654_s13 = smov [#allocation2]   ;;  %s3606_s17 = scalar_lea.hbm %s4469_s6, 3072 }
   0x2   :  { %s34_s14 = sshll.u32 %s3654_s13, 4  ;;  %p3607_p0 = scmp.ne.s32.totalorder %s4469_s6, %s3606_s17  ;;  %s35_s14 = int_to_ptr.vmem [resolvable:$true] %s34_s14 }
   0x3   :  { %p3610_p1 = scmp.lt.u32.totalorder %s3606_s17, %s4469_s6 }
   0x5   :  { %p3612_p2 = pnand %p3610_p1, %p3607_p0 }
   0x7   :  { %3615 = shalt.err (!%p3612_p2)
}
   0x8   :  { %s3616_s22 = scalar_lea.vmem %s35_s14, 3072  ;;  %p3621_p4 = scmp.lt.s32.totalorder %s35_s14, %s35_s14 }
   0x9   :  { %p3617_p3 = scmp.ne.s32.totalorder %s35_s14, %s3616_s22  ;;  %p3622_p5 = scmp.lt.s32.totalorder %s3616_s22, %s3616_s22 }
   0xb   :  { %p3623_p6 = por %p3622_p5, %p3621_p4 }
   0xd   :  { %p3624_p7 = pnand %p3623_p6, %p3617_p3 }
   0xf   :  { %3627 = shalt.err (!%p3624_p7)
}
  0x10   :  { %s3655_s23 = smov 64   ;;  %s3656_s24 = smov 4  }
  0x11   :  { %40 = dma.hbm_to_vmem [thread:$0]  %s4469_s6, 3072, %s35_s14, [#allocation3], %s3655_s23, %s3655_s23, %s3656_s24  }
  0x12   :  { %s3657_s27 = smov [#allocation4]   ;;  %s3628_s11 = scalar_lea.hbm %s4471_s8, 1024 }
  0x13   :  { %s48_s28 = sshll.u32 %s3657_s27, 4  ;;  %p3629_p8 = scmp.ne.s32.totalorder %s4471_s8, %s3628_s11  ;;  %s49_s28 = int_to_ptr.vmem [resolvable:$true] %s48_s28 }
  0x14   :  { %p3632_p9 = scmp.lt.u32.totalorder %s3628_s11, %s4471_s8 }
  0x16   :  { %p3634_p10 = pnand %p3632_p9, %p3629_p8 }
  0x18   :  { %3637 = shalt.err (!%p3634_p10)
}
  0x19   :  { %s3638_s17 = scalar_lea.vmem %s49_s28, 1024  ;;  %p3643_p12 = scmp.lt.s32.totalorder %s49_s28, %s49_s28 }
  0x1a   :  { %p3639_p11 = scmp.ne.s32.totalorder %s49_s28, %s3638_s17  ;;  %p3644_p13 = scmp.lt.s32.totalorder %s3638_s17, %s3638_s17 }
  0x1c   :  { %p3645_p0 = por %p3644_p13, %p3643_p12 }
  0x1e   :  { %p3646_p1 = pnand %p3645_p0, %p3639_p11 }
  0x20   :  { %3649 = shalt.err (!%p3646_p1)
}
  0x21   :  { %54 = dma.hbm_to_vmem [thread:$0]  %s4471_s8, 1024, %s49_s28, [#allocation5], %s3655_s23, %s3655_s23, %s3656_s24  }
  0x22   :  { %3650 = dma.done.wait [#allocation3], 3072  }
  0x23   :  { %3651 = vsyncadd [#allocation3], 4294964224 }
  0x24   :  { %3652 = dma.done.wait [#allocation5], 1024  }
  0x25   :  { %3653 = vsyncadd [#allocation5], 4294966272  ;;  %v3518_v0 = vld [vmem:[%s4465_s2] sm:$0xff]   ;;  %v3519_v1 = vld [vmem:[%s4465_s2 + $0x8] sm:$0xff]  }
  0x26   :  { %3002 = vmatprep.subr.bf16.mxu0 %v3518_v0  ;;  %v3520_v2 = vld [vmem:[%s4465_s2 + $0x10] sm:$0xff]   ;;  %v3521_v3 = vld [vmem:[%s4465_s2 + $0x18] sm:$0xff]   ;;  %v3526_v4 = vld [vmem:[%s4464_s1] sm:$0xff]  }
  0x27   :  { %3003 = vmatpush3.bf16.msra.mxu0 %v3518_v0  ;;  %3018 = vmatprep.mubr.bf16.mxu0 %v3526_v4  ;;  %v3522_v5 = vld [vmem:[%s4465_s2 + $0x20] sm:$0xff]   ;;  %v3523_v6 = vld [vmem:[%s4465_s2 + $0x28] sm:$0xff]   ;;  %v3524_v7 = vld [vmem:[%s4465_s2 + $0x30] sm:$0xff]  }
  0x28   :  { %3004 = vmatprep.subr.bf16.mxu0 %v3519_v1  ;;  %v3525_v8 = vld [vmem:[%s4465_s2 + $0x38] sm:$0xff]   ;;  %v3527_v9 = vld [vmem:[%s4464_s1 + $0x8] sm:$0xff]   ;;  %v3528_v10 = vld [vmem:[%s4464_s1 + $0x10] sm:$0xff]  }
  0x29   :  { %v3529_v11 = vld [vmem:[%s4464_s1 + $0x18] sm:$0xff]   ;;  %v3530_v12 = vld [vmem:[%s4464_s1 + $0x20] sm:$0xff]   ;;  %v3531_v13 = vld [vmem:[%s4464_s1 + $0x28] sm:$0xff]  }
  0x2a   :  { %v3532_v14 = vld [vmem:[%s4464_s1 + $0x30] sm:$0xff]   ;;  %v3533_v15 = vld [vmem:[%s4464_s1 + $0x38] sm:$0xff]   ;;  %v3788_v16 = vld [vmem:[%s4463_s0] sm:$0xff]  }
  0x2b   :  { %3005 = vmatpush3.bf16.msra.mxu0 %v3519_v1  ;;  %3050 = vmatprep.mubr.bf16.mxu1 %v3788_v16  ;;  %v3542_v17 = vld [vmem:[%s4467_s4] sm:$0xff]   ;;  %v3543_v18 = vld [vmem:[%s4467_s4 + $0x8] sm:$0xff]   ;;  %v3544_v19 = vld [vmem:[%s4467_s4 + $0x10] sm:$0xff]  }
  0x2c   :  { %3006 = vmatprep.subr.bf16.mxu0 %v3520_v2  ;;  %v3545_v20 = vld [vmem:[%s4467_s4 + $0x18] sm:$0xff]   ;;  %v3546_v21 = vld [vmem:[%s4467_s4 + $0x20] sm:$0xff]   ;;  %v3547_v22 = vld [vmem:[%s4467_s4 + $0x28] sm:$0xff]  }
  0x2d   :  { %v3812_v47 = vld [vmem:[%s4463_s0 + $0x8] sm:$0xff]   ;;  %v3817_v48 = vld [vmem:[%s4463_s0 + $0x10] sm:$0xff]   ;;  %v3824_v49 = vld [vmem:[%s4463_s0 + $0x18] sm:$0xff]  }
  0x2e   :  { %v3829_v50 = vld [vmem:[%s4463_s0 + $0x20] sm:$0xff]   ;;  %v3836_v51 = vld [vmem:[%s4463_s0 + $0x28] sm:$0xff]   ;;  %v3841_v52 = vld [vmem:[%s4463_s0 + $0x30] sm:$0xff]  }
  0x2f   :  { %3007 = vmatpush3.bf16.msra.mxu0 %v3520_v2  ;;  %v3848_v53 = vld [vmem:[%s4463_s0 + $0x38] sm:$0xff]   ;;  %v3548_v54 = vld [vmem:[%s4467_s4 + $0x30] sm:$0xff]   ;;  %v2638_v56 = vld [vmem:[%s4466_s3] ss:$0 sm:$0xff] }
  0x30   :  { %3008 = vmatprep.subr.bf16.mxu0 %v3521_v3  ;;  %v3549_v55 = vld [vmem:[%s4467_s4 + $0x38] sm:$0xff]  }
  0x33   :  { %3009 = vmatpush3.bf16.msra.mxu0 %v3521_v3 }
  0x34   :  { %3010 = vmatprep.subr.bf16.mxu0 %v3522_v5 }
  0x37   :  { %3011 = vmatpush3.bf16.msra.mxu0 %v3522_v5 }
  0x38   :  { %3012 = vmatprep.subr.bf16.mxu0 %v3523_v6 }
  0x3b   :  { %3013 = vmatpush3.bf16.msra.mxu0 %v3523_v6 }
  0x3c   :  { %3014 = vmatprep.subr.bf16.mxu0 %v3524_v7 }
  0x3f   :  { %3015 = vmatpush3.bf16.msra.mxu0 %v3524_v7 }
  0x40   :  { %3016 = vmatprep.subr.bf16.mxu0 %v3525_v8 }
  0x43   :  { %3017 = vmatpush3.bf16.msra.mxu0 %v3525_v8 }
  0x44   :  { %3066 = vmatprep.subr.bf16.mxu0 %v3542_v17 }
  0x46   :  { %3019 = vmatmul.mubr.bf16.vlgmr.msra.gmra.mrb[0].mxu0 %v3527_v9 }
  0x47   :  { %3022 = vmatprep.mubr.bf16.mxu0 %v3528_v10  ;;  %3067 = vmatpush3.bf16.msra.mxu0 %v3542_v17 }
  0x48   :  { %3068 = vmatprep.subr.bf16.mxu0 %v3543_v18 }
  0x4b   :  { %3069 = vmatpush3.bf16.msra.mxu0 %v3543_v18 }
  0x4c   :  { %3070 = vmatprep.subr.bf16.mxu0 %v3544_v19 }
  0x4e   :  { %3023 = vmatmul.mubr.bf16.gmra.mrb[4].mxu0 %v3529_v11 }
  0x4f   :  { %3026 = vmatprep.mubr.bf16.mxu0 %v3530_v12  ;;  %3071 = vmatpush3.bf16.msra.mxu0 %v3544_v19 }
  0x50   :  { %3072 = vmatprep.subr.bf16.mxu0 %v3545_v20 }
  0x53   :  { %3073 = vmatpush3.bf16.msra.mxu0 %v3545_v20 }
  0x54   :  { %3074 = vmatprep.subr.bf16.mxu0 %v3546_v21 }
  0x56   :  { %3027 = vmatmul.mubr.bf16.gmra.mrb[8].mxu0 %v3531_v13 }
  0x57   :  { %3030 = vmatprep.mubr.bf16.mxu0 %v3532_v14  ;;  %3075 = vmatpush3.bf16.msra.mxu0 %v3546_v21 }
  0x58   :  { %3076 = vmatprep.subr.bf16.mxu0 %v3547_v22 }
  0x5b   :  { %3077 = vmatpush3.bf16.msra.mxu0 %v3547_v22 }
  0x5c   :  { %3078 = vmatprep.subr.bf16.mxu0 %v3548_v54 }
  0x5e   :  { %3031 = vmatmul.mubr.bf16.gmra.mrb[12].mxu0 %v3533_v15 }
  0x5f   :  { %3079 = vmatpush3.bf16.msra.mxu0 %v3548_v54 }
  0x60   :  { %3080 = vmatprep.subr.bf16.mxu0 %v3549_v55 }
  0x63   :  { %3081 = vmatpush3.bf16.msra.mxu0 %v3549_v55 }
 0x119   :  { %v3020_v23 = vpop.f32.mrb[0].mxu0 }
 0x11a   :  { %v243_v24 = vpop.f32.mrb[1].mxu0 }
 0x11b   :  { %v3021_v25 = vpop.f32.mrb[2].mxu0 }
 0x11c   :  { %v307_v26 = vpack.c.bf16 %v3021_v25, %v3020_v23  ;;  %v246_v27 = vpop.f32.mrb[3].mxu0 }
 0x11d   :  { %v306_v28 = vpack.c.bf16 %v246_v27, %v243_v24 }
 0x11f   :  { %3034 = vmatprep.subr.bf16.mxu1 %v306_v28 }
 0x120   :  { %3035 = vmatpush3.bf16.msra.mxu1 %v306_v28 }
 0x121   :  { %v3024_v29 = vpop.f32.mrb[4].mxu0  ;;  %3036 = vmatprep.subr.bf16.mxu1 %v307_v26 }
 0x122   :  { %v259_v30 = vpop.f32.mrb[5].mxu0 }
 0x123   :  { %v3025_v31 = vpop.f32.mrb[6].mxu0 }
 0x124   :  { %v309_v32 = vpack.c.bf16 %v3025_v31, %v3024_v29  ;;  %v262_v33 = vpop.f32.mrb[7].mxu0  ;;  %3037 = vmatpush3.bf16.msra.mxu1 %v307_v26 }
 0x125   :  { %v308_v34 = vpack.c.bf16 %v262_v33, %v259_v30 }
 0x127   :  { %3038 = vmatprep.subr.bf16.mxu1 %v308_v34 }
 0x128   :  { %3039 = vmatpush3.bf16.msra.mxu1 %v308_v34 }
 0x129   :  { %v3028_v35 = vpop.f32.mrb[8].mxu0  ;;  %3040 = vmatprep.subr.bf16.mxu1 %v309_v32 }
 0x12a   :  { %v275_v36 = vpop.f32.mrb[9].mxu0 }
 0x12b   :  { %v3029_v37 = vpop.f32.mrb[10].mxu0 }
 0x12c   :  { %v311_v38 = vpack.c.bf16 %v3029_v37, %v3028_v35  ;;  %v278_v39 = vpop.f32.mrb[11].mxu0  ;;  %3041 = vmatpush3.bf16.msra.mxu1 %v309_v32 }
 0x12d   :  { %v310_v40 = vpack.c.bf16 %v278_v39, %v275_v36 }
 0x12f   :  { %3042 = vmatprep.subr.bf16.mxu1 %v310_v40 }
 0x130   :  { %3043 = vmatpush3.bf16.msra.mxu1 %v310_v40 }
 0x131   :  { %v3032_v41 = vpop.f32.mrb[12].mxu0  ;;  %3044 = vmatprep.subr.bf16.mxu1 %v311_v38 }
 0x132   :  { %v291_v42 = vpop.f32.mrb[13].mxu0 }
 0x133   :  { %v3033_v43 = vpop.f32.mrb[14].mxu0 }
 0x134   :  { %v313_v44 = vpack.c.bf16 %v3033_v43, %v3032_v41  ;;  %v294_v45 = vpop.f32.mrb[15].mxu0  ;;  %3045 = vmatpush3.bf16.msra.mxu1 %v311_v38 }
 0x135   :  { %v312_v46 = vpack.c.bf16 %v294_v45, %v291_v42 }
 0x137   :  { %3046 = vmatprep.subr.bf16.mxu1 %v312_v46 }
 0x138   :  { %3047 = vmatpush3.bf16.msra.mxu1 %v312_v46 }
 0x139   :  { %3048 = vmatprep.subr.bf16.mxu1 %v313_v44 }
 0x13c   :  { %3049 = vmatpush3.bf16.msra.mxu1 %v313_v44 }
 0x13f   :  { %3051 = vmatmul.mubr.bf16.vlgmr.msra.gmra.mrb[0].mxu1 %v3812_v47 }
 0x140   :  { %3054 = vmatprep.mubr.bf16.mxu1 %v3817_v48 }
 0x147   :  { %3055 = vmatmul.mubr.bf16.gmra.mrb[4].mxu1 %v3824_v49 }
 0x148   :  { %3058 = vmatprep.mubr.bf16.mxu1 %v3829_v50 }
 0x14f   :  { %3059 = vmatmul.mubr.bf16.gmra.mrb[8].mxu1 %v3836_v51 }
 0x150   :  { %3062 = vmatprep.mubr.bf16.mxu1 %v3841_v52 }
 0x157   :  { %3063 = vmatmul.mubr.bf16.gmra.mrb[12].mxu1 %v3848_v53 }
 0x158   :  { %3114 = vmatprep.mubr.bf16.mxu1 %v3788_v16 }
 0x212   :  { %v3052_v57 = vpop.f32.mrb[0].mxu1 }
 0x213   :  { %v402_v58 = vpop.f32.mrb[1].mxu1  ;;  %v3863_v61 = vadd.f32 %v3052_v57, %v2638_v56 }
 0x214   :  { %v3861_v59 = vadd.f32 %v2638_v56, %v402_v58  ;;  %v3053_v60 = vpop.f32.mrb[2].mxu1  ;;  %v3551_v58 = vld [vmem:[#allocation2 + $0x8] sm:$0xff]  }
 0x215   :  { %v3865_v62 = vadd.f32 %v3053_v60, %v2638_v56  ;;  %v405_v63 = vpop.f32.mrb[3].mxu1  ;;  %v467_v4 = vmax.f32 %v3863_v61, 0.0  ;;  %v3552_v60 = vld [vmem:[#allocation2 + $0x10] sm:$0xff]  }
 0x216   :  { %v3867_v0 = vadd.f32 %v2638_v56, %v405_v63  ;;  %v465_v2 = vmax.f32 %v3861_v59, 0.0  ;;  %v3553_v63 = vld [vmem:[#allocation2 + $0x18] sm:$0xff]  }
 0x217   :  { %v468_v1 = vmax.f32 %v3865_v62, 0.0 }
 0x218   :  { %v466_v3 = vmax.f32 %v3867_v0, 0.0 }
 0x219   :  { %v499_v7 = vpack.c.bf16 %v468_v1, %v467_v4 }
 0x21a   :  { %v498_v5 = vpack.c.bf16 %v466_v3, %v465_v2  ;;  %v3056_v6 = vpop.f32.mrb[4].mxu1 }
 0x21b   :  { %v418_v8 = vpop.f32.mrb[5].mxu1  ;;  %v3883_v11 = vadd.f32 %v3056_v6, %v2638_v56  ;;  %v3555_v6 = vld [vmem:[#allocation2 + $0x28] sm:$0xff]  }
 0x21c   :  { %v3881_v9 = vadd.f32 %v2638_v56, %v418_v8  ;;  %v3057_v10 = vpop.f32.mrb[6].mxu1  ;;  %3082 = vmatprep.mubr.bf16.mxu0 %v498_v5  ;;  %v3554_v5 = vld [vmem:[#allocation2 + $0x20] sm:$0xff]  }
 0x21d   :  { %v3885_v12 = vadd.f32 %v3057_v10, %v2638_v56  ;;  %v421_v13 = vpop.f32.mrb[7].mxu1  ;;  %3083 = vmatmul.mubr.bf16.vlgmr.msra.gmra.mrb[16].mxu0 %v499_v7  ;;  %v471_v19 = vmax.f32 %v3883_v11, 0.0 }
 0x21e   :  { %v3887_v14 = vadd.f32 %v2638_v56, %v421_v13  ;;  %v469_v17 = vmax.f32 %v3881_v9, 0.0 }
 0x21f   :  { %v472_v15 = vmax.f32 %v3885_v12, 0.0 }
 0x220   :  { %v470_v18 = vmax.f32 %v3887_v14, 0.0 }
 0x221   :  { %v501_v22 = vpack.c.bf16 %v472_v15, %v471_v19 }
 0x222   :  { %v500_v20 = vpack.c.bf16 %v470_v18, %v469_v17  ;;  %v3060_v21 = vpop.f32.mrb[8].mxu1 }
 0x223   :  { %v434_v23 = vpop.f32.mrb[9].mxu1  ;;  %v3903_v26 = vadd.f32 %v3060_v21, %v2638_v56 }
 0x224   :  { %v3901_v24 = vadd.f32 %v2638_v56, %v434_v23  ;;  %v3061_v25 = vpop.f32.mrb[10].mxu1  ;;  %3086 = vmatprep.mubr.bf16.mxu0 %v500_v20 }
 0x225   :  { %v3905_v27 = vadd.f32 %v3061_v25, %v2638_v56  ;;  %v437_v28 = vpop.f32.mrb[11].mxu1  ;;  %3087 = vmatmul.mubr.bf16.gmra.mrb[20].mxu0 %v501_v22  ;;  %v475_v33 = vmax.f32 %v3903_v26, 0.0 }
 0x226   :  { %v3907_v29 = vadd.f32 %v2638_v56, %v437_v28  ;;  %v473_v31 = vmax.f32 %v3901_v24, 0.0 }
 0x227   :  { %v476_v30 = vmax.f32 %v3905_v27, 0.0 }
 0x228   :  { %v474_v32 = vmax.f32 %v3907_v29, 0.0 }
 0x229   :  { %v503_v36 = vpack.c.bf16 %v476_v30, %v475_v33 }
 0x22a   :  { %v502_v34 = vpack.c.bf16 %v474_v32, %v473_v31  ;;  %v3064_v35 = vpop.f32.mrb[12].mxu1 }
 0x22b   :  { %v450_v37 = vpop.f32.mrb[13].mxu1  ;;  %v3923_v40 = vadd.f32 %v3064_v35, %v2638_v56 }
 0x22c   :  { %v3921_v38 = vadd.f32 %v2638_v56, %v450_v37  ;;  %v3065_v39 = vpop.f32.mrb[14].mxu1  ;;  %3090 = vmatprep.mubr.bf16.mxu0 %v502_v34 }
 0x22d   :  { %v3925_v41 = vadd.f32 %v3065_v39, %v2638_v56  ;;  %v453_v42 = vpop.f32.mrb[15].mxu1  ;;  %3091 = vmatmul.mubr.bf16.gmra.mrb[24].mxu0 %v503_v36  ;;  %v479_v54 = vmax.f32 %v3923_v40, 0.0 }
 0x22e   :  { %v3927_v43 = vadd.f32 %v2638_v56, %v453_v42  ;;  %v477_v45 = vmax.f32 %v3921_v38, 0.0  ;;  %v3550_v56 = vld [vmem:[#allocation2] sm:$0xff]  }
 0x22f   :  { %v480_v44 = vmax.f32 %v3925_v41, 0.0  ;;  %3130 = vmatprep.subr.bf16.mxu0 %v3550_v56 }
 0x230   :  { %v478_v46 = vmax.f32 %v3927_v43, 0.0  ;;  %3131 = vmatpush3.bf16.msra.mxu0 %v3550_v56  ;;  %v3566_v43 = vld [vmem:[#allocation2 + $0x40] sm:$0xff]  }
 0x231   :  { %v505_v57 = vpack.c.bf16 %v480_v44, %v479_v54  ;;  %3132 = vmatprep.subr.bf16.mxu0 %v3551_v58 }
 0x232   :  { %v504_v55 = vpack.c.bf16 %v478_v46, %v477_v45 }
 0x234   :  { %3094 = vmatprep.mubr.bf16.mxu0 %v504_v55  ;;  %3133 = vmatpush3.bf16.msra.mxu0 %v3551_v58 }
 0x235   :  { %3095 = vmatmul.mubr.bf16.gmra.mrb[28].mxu0 %v505_v57  ;;  %3134 = vmatprep.subr.bf16.mxu0 %v3552_v60 }
 0x238   :  { %3135 = vmatpush3.bf16.msra.mxu0 %v3552_v60 }
 0x239   :  { %3136 = vmatprep.subr.bf16.mxu0 %v3553_v63 }
 0x23c   :  { %3137 = vmatpush3.bf16.msra.mxu0 %v3553_v63 }
 0x23d   :  { %3138 = vmatprep.subr.bf16.mxu0 %v3554_v5 }
 0x240   :  { %3139 = vmatpush3.bf16.msra.mxu0 %v3554_v5 }
 0x241   :  { %3140 = vmatprep.subr.bf16.mxu0 %v3555_v6 }
 0x244   :  { %3141 = vmatpush3.bf16.msra.mxu0 %v3555_v6 }
 0x2f0   :  { %v3084_v7 = vpop.f32.mrb[16].mxu0 }
 0x2f1   :  { %v588_v8 = vpop.f32.mrb[17].mxu0 }
 0x2f2   :  { %v3085_v10 = vpop.f32.mrb[18].mxu0 }
 0x2f3   :  { %v652_v13 = vpack.c.bf16 %v3085_v10, %v3084_v7  ;;  %v591_v20 = vpop.f32.mrb[19].mxu0  ;;  %v3556_v7 = vld [vmem:[#allocation2 + $0x30] sm:$0xff]   ;;  %v2655_v10 = vld [vmem:[%s4468_s5] ss:$0 sm:$0xff] }
 0x2f4   :  { %v651_v21 = vpack.c.bf16 %v591_v20, %v588_v8  ;;  %3142 = vmatprep.subr.bf16.mxu0 %v3556_v7  ;;  %v3557_v8 = vld [vmem:[#allocation2 + $0x38] sm:$0xff]  }
 0x2f5   :  { %3143 = vmatpush3.bf16.msra.mxu0 %v3556_v7 }
 0x2f6   :  { %3098 = vmatprep.subr.bf16.mxu1 %v651_v21  ;;  %3144 = vmatprep.subr.bf16.mxu0 %v3557_v8 }
 0x2f7   :  { %3099 = vmatpush3.bf16.msra.mxu1 %v651_v21 }
 0x2f8   :  { %v3088_v22 = vpop.f32.mrb[20].mxu0  ;;  %3100 = vmatprep.subr.bf16.mxu1 %v652_v13 }
 0x2f9   :  { %v604_v23 = vpop.f32.mrb[21].mxu0  ;;  %3145 = vmatpush3.bf16.msra.mxu0 %v3557_v8 }
 0x2fa   :  { %v3089_v25 = vpop.f32.mrb[22].mxu0 }
 0x2fb   :  { %v654_v28 = vpack.c.bf16 %v3089_v25, %v3088_v22  ;;  %v607_v34 = vpop.f32.mrb[23].mxu0  ;;  %3101 = vmatpush3.bf16.msra.mxu1 %v652_v13 }
 0x2fc   :  { %v653_v35 = vpack.c.bf16 %v607_v34, %v604_v23 }
 0x2fe   :  { %3102 = vmatprep.subr.bf16.mxu1 %v653_v35 }
 0x2ff   :  { %3103 = vmatpush3.bf16.msra.mxu1 %v653_v35 }
 0x300   :  { %v3092_v36 = vpop.f32.mrb[24].mxu0  ;;  %3104 = vmatprep.subr.bf16.mxu1 %v654_v28 }
 0x301   :  { %v620_v37 = vpop.f32.mrb[25].mxu0 }
 0x302   :  { %v3093_v39 = vpop.f32.mrb[26].mxu0 }
 0x303   :  { %v656_v42 = vpack.c.bf16 %v3093_v39, %v3092_v36  ;;  %v623_v55 = vpop.f32.mrb[27].mxu0  ;;  %3105 = vmatpush3.bf16.msra.mxu1 %v654_v28 }
 0x304   :  { %v655_v57 = vpack.c.bf16 %v623_v55, %v620_v37 }
 0x306   :  { %3106 = vmatprep.subr.bf16.mxu1 %v655_v57 }
 0x307   :  { %3107 = vmatpush3.bf16.msra.mxu1 %v655_v57 }
 0x308   :  { %v3096_v56 = vpop.f32.mrb[28].mxu0  ;;  %3108 = vmatprep.subr.bf16.mxu1 %v656_v42 }
 0x309   :  { %v636_v58 = vpop.f32.mrb[29].mxu0 }
 0x30a   :  { %v3097_v60 = vpop.f32.mrb[30].mxu0 }
 0x30b   :  { %v658_v63 = vpack.c.bf16 %v3097_v60, %v3096_v56  ;;  %v639_v5 = vpop.f32.mrb[31].mxu0  ;;  %3109 = vmatpush3.bf16.msra.mxu1 %v656_v42 }
 0x30c   :  { %v657_v6 = vpack.c.bf16 %v639_v5, %v636_v58 }
 0x30e   :  { %3110 = vmatprep.subr.bf16.mxu1 %v657_v6 }
 0x30f   :  { %3111 = vmatpush3.bf16.msra.mxu1 %v657_v6 }
 0x310   :  { %3112 = vmatprep.subr.bf16.mxu1 %v658_v63 }
 0x313   :  { %3113 = vmatpush3.bf16.msra.mxu1 %v658_v63 }
 0x316   :  { %3115 = vmatmul.mubr.bf16.vlgmr.msra.gmra.mrb[16].mxu1 %v3812_v47 }
 0x317   :  { %3118 = vmatprep.mubr.bf16.mxu1 %v3817_v48 }
 0x31e   :  { %3119 = vmatmul.mubr.bf16.gmra.mrb[20].mxu1 %v3824_v49 }
 0x31f   :  { %3122 = vmatprep.mubr.bf16.mxu1 %v3829_v50 }
 0x326   :  { %3123 = vmatmul.mubr.bf16.gmra.mrb[24].mxu1 %v3836_v51 }
 0x327   :  { %3126 = vmatprep.mubr.bf16.mxu1 %v3841_v52 }
 0x32e   :  { %3127 = vmatmul.mubr.bf16.gmra.mrb[28].mxu1 %v3848_v53 }
 0x32f   :  { %3178 = vmatprep.mubr.bf16.mxu1 %v3788_v16 }
 0x3e9   :  { %v3116_v13 = vpop.f32.mrb[16].mxu1 }
 0x3ea   :  { %v708_v20 = vadd.f32 %v3116_v13, %v2655_v10  ;;  %v699_v21 = vpop.f32.mrb[17].mxu1 }
 0x3eb   :  { %v700_v22 = vadd.f32 %v2655_v10, %v699_v21  ;;  %v3117_v23 = vpop.f32.mrb[18].mxu1 }
 0x3ec   :  { %v711_v25 = vadd.f32 %v3117_v23, %v2655_v10  ;;  %v702_v28 = vpop.f32.mrb[19].mxu1  ;;  %v764_v35 = vmax.f32 %v708_v20, 0.0 }
 0x3ed   :  { %v703_v34 = vadd.f32 %v2655_v10, %v702_v28  ;;  %v762_v37 = vmax.f32 %v700_v22, 0.0 }
 0x3ee   :  { %v765_v36 = vmax.f32 %v711_v25, 0.0 }
 0x3ef   :  { %v763_v39 = vmax.f32 %v703_v34, 0.0 }
 0x3f0   :  { %v796_v42 = vpack.c.bf16 %v765_v36, %v764_v35 }
 0x3f1   :  { %v795_v55 = vpack.c.bf16 %v763_v39, %v762_v37  ;;  %v3120_v57 = vpop.f32.mrb[20].mxu1 }
 0x3f2   :  { %v724_v56 = vadd.f32 %v3120_v57, %v2655_v10  ;;  %v715_v58 = vpop.f32.mrb[21].mxu1 }
 0x3f3   :  { %v716_v60 = vadd.f32 %v2655_v10, %v715_v58  ;;  %v3121_v63 = vpop.f32.mrb[22].mxu1  ;;  %3146 = vmatprep.mubr.bf16.mxu0 %v795_v55 }
 0x3f4   :  { %v727_v5 = vadd.f32 %v3121_v63, %v2655_v10  ;;  %v718_v6 = vpop.f32.mrb[23].mxu1  ;;  %3147 = vmatmul.mubr.bf16.vlgmr.msra.gmra.mrb[32].mxu0 %v796_v42  ;;  %v768_v8 = vmax.f32 %v724_v56, 0.0 }
 0x3f5   :  { %v719_v7 = vadd.f32 %v2655_v10, %v718_v6  ;;  %v766_v21 = vmax.f32 %v716_v60, 0.0 }
 0x3f6   :  { %v769_v13 = vmax.f32 %v727_v5, 0.0 }
 0x3f7   :  { %v767_v23 = vmax.f32 %v719_v7, 0.0 }
 0x3f8   :  { %v798_v20 = vpack.c.bf16 %v769_v13, %v768_v8 }
 0x3f9   :  { %v797_v25 = vpack.c.bf16 %v767_v23, %v766_v21  ;;  %v3124_v22 = vpop.f32.mrb[24].mxu1 }
 0x3fa   :  { %v740_v28 = vadd.f32 %v3124_v22, %v2655_v10  ;;  %v731_v34 = vpop.f32.mrb[25].mxu1 }
 0x3fb   :  { %v732_v35 = vadd.f32 %v2655_v10, %v731_v34  ;;  %v3125_v36 = vpop.f32.mrb[26].mxu1  ;;  %3150 = vmatprep.mubr.bf16.mxu0 %v797_v25 }
 0x3fc   :  { %v743_v37 = vadd.f32 %v3125_v36, %v2655_v10  ;;  %v734_v39 = vpop.f32.mrb[27].mxu1  ;;  %3151 = vmatmul.mubr.bf16.gmra.mrb[36].mxu0 %v798_v20  ;;  %v772_v57 = vmax.f32 %v740_v28, 0.0 }
 0x3fd   :  { %v735_v55 = vadd.f32 %v2655_v10, %v734_v39  ;;  %v770_v42 = vmax.f32 %v732_v35, 0.0  ;;  %v3558_v35 = vld [vmem:[%s4467_s4 + $0x40] sm:$0xff]   ;;  %v3559_v39 = vld [vmem:[%s4467_s4 + $0x48] sm:$0xff]  }
 0x3fe   :  { %v773_v58 = vmax.f32 %v743_v37, 0.0  ;;  %3194 = vmatprep.subr.bf16.mxu0 %v3558_v35 }
 0x3ff   :  { %v771_v63 = vmax.f32 %v735_v55, 0.0  ;;  %3195 = vmatpush3.bf16.msra.mxu0 %v3558_v35  ;;  %v3561_v55 = vld [vmem:[%s4467_s4 + $0x58] sm:$0xff]  }
 0x400   :  { %v800_v56 = vpack.c.bf16 %v773_v58, %v772_v57  ;;  %3196 = vmatprep.subr.bf16.mxu0 %v3559_v39  ;;  %v3562_v57 = vld [vmem:[%s4467_s4 + $0x60] sm:$0xff]  }
 0x401   :  { %v799_v5 = vpack.c.bf16 %v771_v63, %v770_v42  ;;  %v3128_v60 = vpop.f32.mrb[28].mxu1 }
 0x402   :  { %v756_v6 = vadd.f32 %v3128_v60, %v2655_v10  ;;  %v747_v7 = vpop.f32.mrb[29].mxu1 }
 0x403   :  { %v748_v8 = vadd.f32 %v2655_v10, %v747_v7  ;;  %v3129_v13 = vpop.f32.mrb[30].mxu1  ;;  %3154 = vmatprep.mubr.bf16.mxu0 %v799_v5  ;;  %3197 = vmatpush3.bf16.msra.mxu0 %v3559_v39 }
 0x404   :  { %v759_v21 = vadd.f32 %v3129_v13, %v2655_v10  ;;  %v750_v23 = vpop.f32.mrb[31].mxu1  ;;  %3155 = vmatmul.mubr.bf16.gmra.mrb[40].mxu0 %v800_v56  ;;  %v776_v22 = vmax.f32 %v756_v6, 0.0 }
 0x405   :  { %v751_v25 = vadd.f32 %v2655_v10, %v750_v23  ;;  %v774_v20 = vmax.f32 %v748_v8, 0.0  ;;  %v3560_v10 = vld [vmem:[%s4467_s4 + $0x50] sm:$0xff]  }
 0x406   :  { %v777_v34 = vmax.f32 %v759_v21, 0.0  ;;  %3198 = vmatprep.subr.bf16.mxu0 %v3560_v10 }
 0x407   :  { %v775_v36 = vmax.f32 %v751_v25, 0.0  ;;  %3199 = vmatpush3.bf16.msra.mxu0 %v3560_v10 }
 0x408   :  { %v802_v28 = vpack.c.bf16 %v777_v34, %v776_v22  ;;  %3200 = vmatprep.subr.bf16.mxu0 %v3561_v55 }
 0x409   :  { %v801_v37 = vpack.c.bf16 %v775_v36, %v774_v20 }
 0x40b   :  { %3158 = vmatprep.mubr.bf16.mxu0 %v801_v37  ;;  %3201 = vmatpush3.bf16.msra.mxu0 %v3561_v55 }
 0x40c   :  { %3159 = vmatmul.mubr.bf16.gmra.mrb[44].mxu0 %v802_v28  ;;  %3202 = vmatprep.subr.bf16.mxu0 %v3562_v57 }
 0x40f   :  { %3203 = vmatpush3.bf16.msra.mxu0 %v3562_v57 }
 0x4c7   :  { %v3148_v58 = vpop.f32.mrb[32].mxu0 }
 0x4c8   :  { %v885_v42 = vpop.f32.mrb[33].mxu0 }
 0x4c9   :  { %v3149_v63 = vpop.f32.mrb[34].mxu0 }
 0x4ca   :  { %v949_v56 = vpack.c.bf16 %v3149_v63, %v3148_v58  ;;  %v888_v5 = vpop.f32.mrb[35].mxu0  ;;  %v3563_v58 = vld [vmem:[%s4467_s4 + $0x68] sm:$0xff]   ;;  %v3565_v63 = vld [vmem:[%s4467_s4 + $0x78] sm:$0xff]  }
 0x4cb   :  { %v948_v60 = vpack.c.bf16 %v888_v5, %v885_v42  ;;  %3204 = vmatprep.subr.bf16.mxu0 %v3563_v58  ;;  %v3564_v42 = vld [vmem:[%s4467_s4 + $0x70] sm:$0xff]  }
 0x4cc   :  { %3205 = vmatpush3.bf16.msra.mxu0 %v3563_v58 }
 0x4cd   :  { %3162 = vmatprep.subr.bf16.mxu1 %v948_v60  ;;  %3206 = vmatprep.subr.bf16.mxu0 %v3564_v42 }
 0x4ce   :  { %3163 = vmatpush3.bf16.msra.mxu1 %v948_v60 }
 0x4cf   :  { %v3152_v6 = vpop.f32.mrb[36].mxu0  ;;  %3164 = vmatprep.subr.bf16.mxu1 %v949_v56 }
 0x4d0   :  { %v901_v7 = vpop.f32.mrb[37].mxu0  ;;  %3207 = vmatpush3.bf16.msra.mxu0 %v3564_v42 }
 0x4d1   :  { %v3153_v8 = vpop.f32.mrb[38].mxu0  ;;  %3208 = vmatprep.subr.bf16.mxu0 %v3565_v63 }
 0x4d2   :  { %v951_v13 = vpack.c.bf16 %v3153_v8, %v3152_v6  ;;  %v904_v21 = vpop.f32.mrb[39].mxu0  ;;  %3165 = vmatpush3.bf16.msra.mxu1 %v949_v56  ;;  %v3987_v56 = vld [vmem:[%s4470_s7] ss:$0 sm:$0xff] }
 0x4d3   :  { %v950_v23 = vpack.c.bf16 %v904_v21, %v901_v7 }
 0x4d4   :  { %3209 = vmatpush3.bf16.msra.mxu0 %v3565_v63 }
 0x4d5   :  { %3166 = vmatprep.subr.bf16.mxu1 %v950_v23  ;;  %3258 = vmatprep.subr.bf16.mxu0 %v3566_v43 }
 0x4d6   :  { %3167 = vmatpush3.bf16.msra.mxu1 %v950_v23 }
 0x4d7   :  { %v3156_v25 = vpop.f32.mrb[40].mxu0  ;;  %3168 = vmatprep.subr.bf16.mxu1 %v951_v13 }
 0x4d8   :  { %v917_v22 = vpop.f32.mrb[41].mxu0 }
 0x4d9   :  { %v3157_v34 = vpop.f32.mrb[42].mxu0 }
 0x4da   :  { %v953_v20 = vpack.c.bf16 %v3157_v34, %v3156_v25  ;;  %v920_v36 = vpop.f32.mrb[43].mxu0  ;;  %3169 = vmatpush3.bf16.msra.mxu1 %v951_v13 }
 0x4db   :  { %v952_v28 = vpack.c.bf16 %v920_v36, %v917_v22 }
 0x4dd   :  { %3170 = vmatprep.subr.bf16.mxu1 %v952_v28 }
 0x4de   :  { %3171 = vmatpush3.bf16.msra.mxu1 %v952_v28 }
 0x4df   :  { %v3160_v37 = vpop.f32.mrb[44].mxu0  ;;  %3172 = vmatprep.subr.bf16.mxu1 %v953_v20 }
 0x4e0   :  { %v933_v35 = vpop.f32.mrb[45].mxu0 }
 0x4e1   :  { %v3161_v39 = vpop.f32.mrb[46].mxu0 }
 0x4e2   :  { %v955_v10 = vpack.c.bf16 %v3161_v39, %v3160_v37  ;;  %v936_v55 = vpop.f32.mrb[47].mxu0  ;;  %3173 = vmatpush3.bf16.msra.mxu1 %v953_v20 }
 0x4e3   :  { %v954_v57 = vpack.c.bf16 %v936_v55, %v933_v35 }
 0x4e5   :  { %3174 = vmatprep.subr.bf16.mxu1 %v954_v57 }
 0x4e6   :  { %3175 = vmatpush3.bf16.msra.mxu1 %v954_v57 }
 0x4e7   :  { %3176 = vmatprep.subr.bf16.mxu1 %v955_v10 }
 0x4ea   :  { %3177 = vmatpush3.bf16.msra.mxu1 %v955_v10 }
 0x4ed   :  { %3179 = vmatmul.mubr.bf16.vlgmr.msra.gmra.mrb[32].mxu1 %v3812_v47 }
 0x4ee   :  { %3182 = vmatprep.mubr.bf16.mxu1 %v3817_v48 }
 0x4f5   :  { %3183 = vmatmul.mubr.bf16.gmra.mrb[36].mxu1 %v3824_v49 }
 0x4f6   :  { %3186 = vmatprep.mubr.bf16.mxu1 %v3829_v50 }
 0x4fd   :  { %3187 = vmatmul.mubr.bf16.gmra.mrb[40].mxu1 %v3836_v51 }
 0x4fe   :  { %3190 = vmatprep.mubr.bf16.mxu1 %v3841_v52 }
 0x505   :  { %3191 = vmatmul.mubr.bf16.gmra.mrb[44].mxu1 %v3848_v53 }
 0x506   :  { %3242 = vmatprep.mubr.bf16.mxu1 %v3788_v16 }
 0x5c0   :  { %v3180_v5 = vpop.f32.mrb[32].mxu1 }
 0x5c1   :  { %v1005_v60 = vadd.f32 %v3180_v5, %v3987_v56  ;;  %v996_v6 = vpop.f32.mrb[33].mxu1 }
 0x5c2   :  { %v997_v7 = vadd.f32 %v3987_v56, %v996_v6  ;;  %v3181_v8 = vpop.f32.mrb[34].mxu1 }
 0x5c3   :  { %v1008_v13 = vadd.f32 %v3181_v8, %v3987_v56  ;;  %v999_v21 = vpop.f32.mrb[35].mxu1  ;;  %v3999_v22 = vadd.f32 %v1005_v60, %v467_v4 }
 0x5c4   :  { %v3994_v23 = vadd.f32 %v997_v7, %v465_v2  ;;  %v1000_v25 = vadd.f32 %v3987_v56, %v999_v21 }
 0x5c5   :  { %v4003_v34 = vadd.f32 %v1008_v13, %v468_v1  ;;  %v1077_v37 = vmax.f32 %v3999_v22, 0.0 }
 0x5c6   :  { %v4007_v20 = vadd.f32 %v1000_v25, %v466_v3  ;;  %v1075_v59 = vmax.f32 %v3994_v23, 0.0 }
 0x5c7   :  { %v1078_v36 = vmax.f32 %v4003_v34, 0.0 }
 0x5c8   :  { %v1076_v2 = vmax.f32 %v4007_v20, 0.0  ;;  %v3184_v28 = vpop.f32.mrb[36].mxu1 }
 0x5c9   :  { %v1021_v61 = vadd.f32 %v3184_v28, %v3987_v56  ;;  %v1012_v4 = vpop.f32.mrb[37].mxu1  ;;  %v1111_v3 = vpack.c.bf16 %v1078_v36, %v1077_v37 }
 0x5ca   :  { %v1013_v62 = vadd.f32 %v3987_v56, %v1012_v4  ;;  %v3185_v1 = vpop.f32.mrb[38].mxu1  ;;  %v1110_v0 = vpack.c.bf16 %v1076_v2, %v1075_v59 }
 0x5cb   :  { %v1024_v35 = vadd.f32 %v3185_v1, %v3987_v56  ;;  %v1015_v39 = vpop.f32.mrb[39].mxu1  ;;  %v4031_v57 = vadd.f32 %v1021_v61, %v471_v19 }
 0x5cc   :  { %v4026_v10 = vadd.f32 %v1013_v62, %v469_v17  ;;  %v1016_v55 = vadd.f32 %v3987_v56, %v1015_v39  ;;  %3210 = vmatprep.mubr.bf16.mxu0 %v1110_v0 }
 0x5cd   :  { %v4035_v58 = vadd.f32 %v1024_v35, %v472_v15  ;;  %3211 = vmatmul.mubr.bf16.vlgmr.msra.gmra.mrb[48].mxu0 %v1111_v3  ;;  %v1081_v11 = vmax.f32 %v4031_v57, 0.0 }
 0x5ce   :  { %v4039_v42 = vadd.f32 %v1016_v55, %v470_v18  ;;  %v1079_v17 = vmax.f32 %v4026_v10, 0.0  ;;  %3259 = vmatpush3.bf16.msra.mxu0 %v3566_v43 }
 0x5cf   :  { %v1082_v9 = vmax.f32 %v4035_v58, 0.0 }
 0x5d0   :  { %v1080_v63 = vmax.f32 %v4039_v42, 0.0  ;;  %v3188_v5 = vpop.f32.mrb[40].mxu1 }
 0x5d1   :  { %v1037_v19 = vadd.f32 %v3188_v5, %v3987_v56  ;;  %v1028_v60 = vpop.f32.mrb[41].mxu1  ;;  %v1113_v7 = vpack.c.bf16 %v1082_v9, %v1081_v11 }
 0x5d2   :  { %v1029_v12 = vadd.f32 %v3987_v56, %v1028_v60  ;;  %v3189_v15 = vpop.f32.mrb[42].mxu1  ;;  %v1112_v14 = vpack.c.bf16 %v1080_v63, %v1079_v17  ;;  %v3570_v60 = vld [vmem:[#allocation2 + $0x60] sm:$0xff]  }
 0x5d3   :  { %v1040_v18 = vadd.f32 %v3189_v15, %v3987_v56  ;;  %v1031_v6 = vpop.f32.mrb[43].mxu1  ;;  %v4063_v21 = vadd.f32 %v1037_v19, %v475_v33 }
 0x5d4   :  { %v4058_v8 = vadd.f32 %v1029_v12, %v473_v31  ;;  %v1032_v13 = vadd.f32 %v3987_v56, %v1031_v6  ;;  %3214 = vmatprep.mubr.bf16.mxu0 %v1112_v14  ;;  %v3571_v12 = vld [vmem:[#allocation2 + $0x68] sm:$0xff]  }
 0x5d5   :  { %v4067_v25 = vadd.f32 %v1040_v18, %v476_v30  ;;  %3215 = vmatmul.mubr.bf16.gmra.mrb[52].mxu0 %v1113_v7  ;;  %v1085_v26 = vmax.f32 %v4063_v21, 0.0 }
 0x5d6   :  { %v4071_v28 = vadd.f32 %v1032_v13, %v474_v32  ;;  %v1083_v31 = vmax.f32 %v4058_v8, 0.0 }
 0x5d7   :  { %v1086_v24 = vmax.f32 %v4067_v25, 0.0 }
 0x5d8   :  { %v1084_v61 = vmax.f32 %v4071_v28, 0.0  ;;  %v3192_v4 = vpop.f32.mrb[44].mxu1 }
 0x5d9   :  { %v1053_v33 = vadd.f32 %v3192_v4, %v3987_v56  ;;  %v1044_v62 = vpop.f32.mrb[45].mxu1  ;;  %v1115_v0 = vpack.c.bf16 %v1086_v24, %v1085_v26 }
 0x5da   :  { %v1045_v27 = vadd.f32 %v3987_v56, %v1044_v62  ;;  %v3193_v30 = vpop.f32.mrb[46].mxu1  ;;  %v1114_v29 = vpack.c.bf16 %v1084_v61, %v1083_v31 }
 0x5db   :  { %v1056_v32 = vadd.f32 %v3193_v30, %v3987_v56  ;;  %v1047_v1 = vpop.f32.mrb[47].mxu1  ;;  %v4095_v39 = vadd.f32 %v1053_v33, %v479_v54  ;;  %v3569_v54 = vld [vmem:[#allocation2 + $0x58] sm:$0xff]  }
 0x5dc   :  { %v4090_v3 = vadd.f32 %v1045_v27, %v477_v45  ;;  %v1048_v35 = vadd.f32 %v3987_v56, %v1047_v1  ;;  %3218 = vmatprep.mubr.bf16.mxu0 %v1114_v29 }
 0x5dd   :  { %v4099_v55 = vadd.f32 %v1056_v32, %v480_v44  ;;  %3219 = vmatmul.mubr.bf16.gmra.mrb[56].mxu0 %v1115_v0  ;;  %v1089_v19 = vmax.f32 %v4095_v39, 0.0  ;;  %v3567_v44 = vld [vmem:[#allocation2 + $0x48] sm:$0xff]  }
 0x5de   :  { %v4103_v5 = vadd.f32 %v1048_v35, %v478_v46  ;;  %v1087_v45 = vmax.f32 %v4090_v3, 0.0  ;;  %3260 = vmatprep.subr.bf16.mxu0 %v3567_v44  ;;  %v3568_v46 = vld [vmem:[#allocation2 + $0x50] sm:$0xff]  }
 0x5df   :  { %v1090_v38 = vmax.f32 %v4099_v55, 0.0  ;;  %3261 = vmatpush3.bf16.msra.mxu0 %v3567_v44 }
 0x5e0   :  { %v1088_v56 = vmax.f32 %v4103_v5, 0.0  ;;  %3262 = vmatprep.subr.bf16.mxu0 %v3568_v46  ;;  %v3582_v5 = vld [vmem:[#allocation2 + $0x80] sm:$0xff]  }
 0x5e1   :  { %v1117_v41 = vpack.c.bf16 %v1090_v38, %v1089_v19 }
 0x5e2   :  { %v1116_v40 = vpack.c.bf16 %v1088_v56, %v1087_v45 }
 0x5e3   :  { %3263 = vmatpush3.bf16.msra.mxu0 %v3568_v46 }
 0x5e4   :  { %3222 = vmatprep.mubr.bf16.mxu0 %v1116_v40  ;;  %3264 = vmatprep.subr.bf16.mxu0 %v3569_v54 }
 0x5e5   :  { %3223 = vmatmul.mubr.bf16.gmra.mrb[60].mxu0 %v1117_v41 }
 0x5e7   :  { %3265 = vmatpush3.bf16.msra.mxu0 %v3569_v54 }
 0x5e8   :  { %3266 = vmatprep.subr.bf16.mxu0 %v3570_v60 }
 0x5eb   :  { %3267 = vmatpush3.bf16.msra.mxu0 %v3570_v60 }
 0x5ec   :  { %3268 = vmatprep.subr.bf16.mxu0 %v3571_v12 }
 0x5ef   :  { %3269 = vmatpush3.bf16.msra.mxu0 %v3571_v12 }
 0x6a0   :  { %v3212_v15 = vpop.f32.mrb[48].mxu0 }
 0x6a1   :  { %v1200_v14 = vpop.f32.mrb[49].mxu0 }
 0x6a2   :  { %v3213_v18 = vpop.f32.mrb[50].mxu0 }
 0x6a3   :  { %v1264_v6 = vpack.c.bf16 %v3213_v18, %v3212_v15  ;;  %v1203_v7 = vpop.f32.mrb[51].mxu0  ;;  %v3572_v15 = vld [vmem:[#allocation2 + $0x70] sm:$0xff]  }
 0x6a4   :  { %v1263_v13 = vpack.c.bf16 %v1203_v7, %v1200_v14  ;;  %3270 = vmatprep.subr.bf16.mxu0 %v3572_v15  ;;  %v3573_v14 = vld [vmem:[#allocation2 + $0x78] sm:$0xff]  }
 0x6a5   :  { %3271 = vmatpush3.bf16.msra.mxu0 %v3572_v15 }
 0x6a6   :  { %3226 = vmatprep.subr.bf16.mxu1 %v1263_v13  ;;  %3272 = vmatprep.subr.bf16.mxu0 %v3573_v14 }
 0x6a7   :  { %3227 = vmatpush3.bf16.msra.mxu1 %v1263_v13 }
 0x6a8   :  { %v3216_v4 = vpop.f32.mrb[52].mxu0  ;;  %3228 = vmatprep.subr.bf16.mxu1 %v1264_v6 }
 0x6a9   :  { %v1216_v33 = vpop.f32.mrb[53].mxu0  ;;  %3273 = vmatpush3.bf16.msra.mxu0 %v3573_v14 }
 0x6aa   :  { %v3217_v62 = vpop.f32.mrb[54].mxu0 }
 0x6ab   :  { %v1266_v27 = vpack.c.bf16 %v3217_v62, %v3216_v4  ;;  %v1219_v30 = vpop.f32.mrb[55].mxu0  ;;  %3229 = vmatpush3.bf16.msra.mxu1 %v1264_v6 }
 0x6ac   :  { %v1265_v29 = vpack.c.bf16 %v1219_v30, %v1216_v33 }
 0x6ae   :  { %3230 = vmatprep.subr.bf16.mxu1 %v1265_v29 }
 0x6af   :  { %3231 = vmatpush3.bf16.msra.mxu1 %v1265_v29 }
 0x6b0   :  { %v3220_v32 = vpop.f32.mrb[56].mxu0  ;;  %3232 = vmatprep.subr.bf16.mxu1 %v1266_v27 }
 0x6b1   :  { %v1232_v1 = vpop.f32.mrb[57].mxu0 }
 0x6b2   :  { %v3221_v0 = vpop.f32.mrb[58].mxu0 }
 0x6b3   :  { %v1268_v35 = vpack.c.bf16 %v3221_v0, %v3220_v32  ;;  %v1235_v40 = vpop.f32.mrb[59].mxu0  ;;  %3233 = vmatpush3.bf16.msra.mxu1 %v1266_v27 }
 0x6b4   :  { %v1267_v41 = vpack.c.bf16 %v1235_v40, %v1232_v1 }
 0x6b6   :  { %3234 = vmatprep.subr.bf16.mxu1 %v1267_v41 }
 0x6b7   :  { %3235 = vmatpush3.bf16.msra.mxu1 %v1267_v41 }
 0x6b8   :  { %v3224_v43 = vpop.f32.mrb[60].mxu0  ;;  %3236 = vmatprep.subr.bf16.mxu1 %v1268_v35 }
 0x6b9   :  { %v1248_v44 = vpop.f32.mrb[61].mxu0 }
 0x6ba   :  { %v3225_v46 = vpop.f32.mrb[62].mxu0 }
 0x6bb   :  { %v1270_v54 = vpack.c.bf16 %v3225_v46, %v3224_v43  ;;  %v1251_v60 = vpop.f32.mrb[63].mxu0  ;;  %3237 = vmatpush3.bf16.msra.mxu1 %v1268_v35 }
 0x6bc   :  { %v1269_v12 = vpack.c.bf16 %v1251_v60, %v1248_v44 }
 0x6be   :  { %3238 = vmatprep.subr.bf16.mxu1 %v1269_v12 }
 0x6bf   :  { %3239 = vmatpush3.bf16.msra.mxu1 %v1269_v12 }
 0x6c0   :  { %3240 = vmatprep.subr.bf16.mxu1 %v1270_v54 }
 0x6c3   :  { %3241 = vmatpush3.bf16.msra.mxu1 %v1270_v54 }
 0x6c6   :  { %3243 = vmatmul.mubr.bf16.vlgmr.msra.gmra.mrb[48].mxu1 %v3812_v47  ;;  %v2690_v47 = vld [vmem:[%s4468_s5 + $0x1] ss:$0 sm:$0xff] }
 0x6c7   :  { %3246 = vmatprep.mubr.bf16.mxu1 %v3817_v48 }
 0x6ce   :  { %3247 = vmatmul.mubr.bf16.gmra.mrb[52].mxu1 %v3824_v49 }
 0x6cf   :  { %3250 = vmatprep.mubr.bf16.mxu1 %v3829_v50 }
 0x6d6   :  { %3251 = vmatmul.mubr.bf16.gmra.mrb[56].mxu1 %v3836_v51 }
 0x6d7   :  { %3254 = vmatprep.mubr.bf16.mxu1 %v3841_v52 }
 0x6de   :  { %3255 = vmatmul.mubr.bf16.gmra.mrb[60].mxu1 %v3848_v53 }
 0x6df   :  { %3306 = vmatprep.mubr.bf16.mxu1 %v3788_v16 }
 0x799   :  { %v3244_v48 = vpop.f32.mrb[48].mxu1 }
 0x79a   :  { %v1320_v49 = vadd.f32 %v3244_v48, %v2690_v47  ;;  %v1311_v50 = vpop.f32.mrb[49].mxu1 }
 0x79b   :  { %v1312_v51 = vadd.f32 %v2690_v47, %v1311_v50  ;;  %v3245_v18 = vpop.f32.mrb[50].mxu1 }
 0x79c   :  { %v1323_v52 = vadd.f32 %v3245_v18, %v2690_v47  ;;  %v1314_v6 = vpop.f32.mrb[51].mxu1  ;;  %v1376_v7 = vmax.f32 %v1320_v49, 0.0 }
 0x79d   :  { %v1315_v53 = vadd.f32 %v2690_v47, %v1314_v6  ;;  %v1374_v13 = vmax.f32 %v1312_v51, 0.0 }
 0x79e   :  { %v1377_v16 = vmax.f32 %v1323_v52, 0.0 }
 0x79f   :  { %v1375_v4 = vmax.f32 %v1315_v53, 0.0 }
 0x7a0   :  { %v1410_v33 = vpack.c.bf16 %v1377_v16, %v1376_v7 }
 0x7a1   :  { %v1409_v62 = vpack.c.bf16 %v1375_v4, %v1374_v13  ;;  %v3248_v27 = vpop.f32.mrb[52].mxu1 }
 0x7a2   :  { %v1336_v30 = vadd.f32 %v3248_v27, %v2690_v47  ;;  %v1327_v29 = vpop.f32.mrb[53].mxu1 }
 0x7a3   :  { %v1328_v32 = vadd.f32 %v2690_v47, %v1327_v29  ;;  %v3249_v1 = vpop.f32.mrb[54].mxu1  ;;  %3274 = vmatprep.mubr.bf16.mxu0 %v1409_v62 }
 0x7a4   :  { %v1339_v0 = vadd.f32 %v3249_v1, %v2690_v47  ;;  %v1330_v35 = vpop.f32.mrb[55].mxu1  ;;  %3275 = vmatmul.mubr.bf16.vlgmr.msra.gmra.mrb[64].mxu0 %v1410_v33  ;;  %v1380_v41 = vmax.f32 %v1336_v30, 0.0 }
 0x7a5   :  { %v1331_v40 = vadd.f32 %v2690_v47, %v1330_v35  ;;  %v1378_v44 = vmax.f32 %v1328_v32, 0.0 }
 0x7a6   :  { %v1381_v43 = vmax.f32 %v1339_v0, 0.0 }
 0x7a7   :  { %v1379_v46 = vmax.f32 %v1331_v40, 0.0 }
 0x7a8   :  { %v1412_v54 = vpack.c.bf16 %v1381_v43, %v1380_v41 }
 0x7a9   :  { %v1411_v60 = vpack.c.bf16 %v1379_v46, %v1378_v44  ;;  %v3252_v12 = vpop.f32.mrb[56].mxu1  ;;  %v3574_v46 = vld [vmem:[%s4467_s4 + $0x80] sm:$0xff]  }
 0x7aa   :  { %v1352_v15 = vadd.f32 %v3252_v12, %v2690_v47  ;;  %v1343_v14 = vpop.f32.mrb[57].mxu1  ;;  %3322 = vmatprep.subr.bf16.mxu0 %v3574_v46  ;;  %v3578_v12 = vld [vmem:[%s4467_s4 + $0xa0] sm:$0xff]  }
 0x7ab   :  { %v1344_v48 = vadd.f32 %v2690_v47, %v1343_v14  ;;  %v3253_v49 = vpop.f32.mrb[58].mxu1  ;;  %3278 = vmatprep.mubr.bf16.mxu0 %v1411_v60  ;;  %3323 = vmatpush3.bf16.msra.mxu0 %v3574_v46  ;;  %v3577_v60 = vld [vmem:[%s4467_s4 + $0x98] sm:$0xff]   ;;  %v4164_v46 = vld [vmem:[%s4463_s0 + $0x20] sm:$0xff]  }
 0x7ac   :  { %v1355_v50 = vadd.f32 %v3253_v49, %v2690_v47  ;;  %v1346_v51 = vpop.f32.mrb[59].mxu1  ;;  %3279 = vmatmul.mubr.bf16.gmra.mrb[68].mxu0 %v1412_v54  ;;  %v1384_v52 = vmax.f32 %v1352_v15, 0.0  ;;  %v3575_v54 = vld [vmem:[%s4467_s4 + $0x88] sm:$0xff]  }
 0x7ad   :  { %v1347_v18 = vadd.f32 %v2690_v47, %v1346_v51  ;;  %v1382_v53 = vmax.f32 %v1344_v48, 0.0  ;;  %3324 = vmatprep.subr.bf16.mxu0 %v3575_v54 }
 0x7ae   :  { %v1385_v6 = vmax.f32 %v1355_v50, 0.0 }
 0x7af   :  { %v1383_v7 = vmax.f32 %v1347_v18, 0.0  ;;  %3325 = vmatpush3.bf16.msra.mxu0 %v3575_v54  ;;  %v4170_v54 = vld [vmem:[%s4463_s0 + $0x28] sm:$0xff]  }
 0x7b0   :  { %v1414_v16 = vpack.c.bf16 %v1385_v6, %v1384_v52 }
 0x7b1   :  { %v1413_v13 = vpack.c.bf16 %v1383_v7, %v1382_v53  ;;  %v3256_v4 = vpop.f32.mrb[60].mxu1 }
 0x7b2   :  { %v1368_v33 = vadd.f32 %v3256_v4, %v2690_v47  ;;  %v1359_v62 = vpop.f32.mrb[61].mxu1 }
 0x7b3   :  { %v1360_v27 = vadd.f32 %v2690_v47, %v1359_v62  ;;  %v3257_v30 = vpop.f32.mrb[62].mxu1  ;;  %3282 = vmatprep.mubr.bf16.mxu0 %v1413_v13 }
 0x7b4   :  { %v1371_v29 = vadd.f32 %v3257_v30, %v2690_v47  ;;  %v1362_v32 = vpop.f32.mrb[63].mxu1  ;;  %3283 = vmatmul.mubr.bf16.gmra.mrb[72].mxu0 %v1414_v16  ;;  %v1388_v0 = vmax.f32 %v1368_v33, 0.0 }
 0x7b5   :  { %v1363_v1 = vadd.f32 %v2690_v47, %v1362_v32  ;;  %v1386_v40 = vmax.f32 %v1360_v27, 0.0  ;;  %v3576_v47 = vld [vmem:[%s4467_s4 + $0x90] sm:$0xff]  }
 0x7b6   :  { %v1389_v35 = vmax.f32 %v1371_v29, 0.0  ;;  %3326 = vmatprep.subr.bf16.mxu0 %v3576_v47 }
 0x7b7   :  { %v1387_v41 = vmax.f32 %v1363_v1, 0.0  ;;  %3327 = vmatpush3.bf16.msra.mxu0 %v3576_v47  ;;  %v4176_v47 = vld [vmem:[%s4463_s0 + $0x30] sm:$0xff]  }
 0x7b8   :  { %v1416_v43 = vpack.c.bf16 %v1389_v35, %v1388_v0  ;;  %3328 = vmatprep.subr.bf16.mxu0 %v3577_v60 }
 0x7b9   :  { %v1415_v44 = vpack.c.bf16 %v1387_v41, %v1386_v40  ;;  %v4146_v41 = vld [vmem:[%s4463_s0 + $0x8] sm:$0xff]  }
 0x7bb   :  { %3286 = vmatprep.mubr.bf16.mxu0 %v1415_v44  ;;  %3329 = vmatpush3.bf16.msra.mxu0 %v3577_v60  ;;  %v4158_v44 = vld [vmem:[%s4463_s0 + $0x18] sm:$0xff]  }
 0x7bc   :  { %3287 = vmatmul.mubr.bf16.gmra.mrb[76].mxu0 %v1416_v43  ;;  %3330 = vmatprep.subr.bf16.mxu0 %v3578_v12  ;;  %v4152_v43 = vld [vmem:[%s4463_s0 + $0x10] sm:$0xff]   ;;  %v4182_v60 = vld [vmem:[%s4463_s0 + $0x38] sm:$0xff]  }
 0x7bf   :  { %3331 = vmatpush3.bf16.msra.mxu0 %v3578_v12  ;;  %v4188_v12 = vld [vmem:[%s4463_s0] sm:$0xff]  }
 0x877   :  { %v3276_v15 = vpop.f32.mrb[64].mxu0 }
 0x878   :  { %v1499_v14 = vpop.f32.mrb[65].mxu0 }
 0x879   :  { %v3277_v48 = vpop.f32.mrb[66].mxu0 }
 0x87a   :  { %v1563_v49 = vpack.c.bf16 %v3277_v48, %v3276_v15  ;;  %v1502_v50 = vpop.f32.mrb[67].mxu0  ;;  %v3579_v15 = vld [vmem:[%s4467_s4 + $0xa8] sm:$0xff]   ;;  %v3581_v48 = vld [vmem:[%s4467_s4 + $0xb8] sm:$0xff]  }
 0x87b   :  { %v1562_v51 = vpack.c.bf16 %v1502_v50, %v1499_v14  ;;  %3332 = vmatprep.subr.bf16.mxu0 %v3579_v15  ;;  %v3580_v14 = vld [vmem:[%s4467_s4 + $0xb0] sm:$0xff]  }
 0x87c   :  { %3333 = vmatpush3.bf16.msra.mxu0 %v3579_v15 }
 0x87d   :  { %3290 = vmatprep.subr.bf16.mxu1 %v1562_v51  ;;  %3334 = vmatprep.subr.bf16.mxu0 %v3580_v14 }
 0x87e   :  { %3291 = vmatpush3.bf16.msra.mxu1 %v1562_v51 }
 0x87f   :  { %v3280_v18 = vpop.f32.mrb[68].mxu0  ;;  %3292 = vmatprep.subr.bf16.mxu1 %v1563_v49 }
 0x880   :  { %v1515_v52 = vpop.f32.mrb[69].mxu0  ;;  %3335 = vmatpush3.bf16.msra.mxu0 %v3580_v14 }
 0x881   :  { %v3281_v6 = vpop.f32.mrb[70].mxu0  ;;  %3336 = vmatprep.subr.bf16.mxu0 %v3581_v48 }
 0x882   :  { %v1565_v53 = vpack.c.bf16 %v3281_v6, %v3280_v18  ;;  %v1518_v7 = vpop.f32.mrb[71].mxu0  ;;  %3293 = vmatpush3.bf16.msra.mxu1 %v1563_v49  ;;  %v4203_v49 = vld [vmem:[%s4470_s7 + $0x1] ss:$0 sm:$0xff] }
 0x883   :  { %v1564_v16 = vpack.c.bf16 %v1518_v7, %v1515_v52 }
 0x884   :  { %3337 = vmatpush3.bf16.msra.mxu0 %v3581_v48 }
 0x885   :  { %3294 = vmatprep.subr.bf16.mxu1 %v1564_v16  ;;  %3386 = vmatprep.subr.bf16.mxu0 %v3582_v5 }
 0x886   :  { %3295 = vmatpush3.bf16.msra.mxu1 %v1564_v16 }
 0x887   :  { %v3284_v13 = vpop.f32.mrb[72].mxu0  ;;  %3296 = vmatprep.subr.bf16.mxu1 %v1565_v53 }
 0x888   :  { %v1531_v4 = vpop.f32.mrb[73].mxu0 }
 0x889   :  { %v3285_v33 = vpop.f32.mrb[74].mxu0 }
 0x88a   :  { %v1567_v62 = vpack.c.bf16 %v3285_v33, %v3284_v13  ;;  %v1534_v27 = vpop.f32.mrb[75].mxu0  ;;  %3297 = vmatpush3.bf16.msra.mxu1 %v1565_v53 }
 0x88b   :  { %v1566_v30 = vpack.c.bf16 %v1534_v27, %v1531_v4 }
 0x88d   :  { %3298 = vmatprep.subr.bf16.mxu1 %v1566_v30 }
 0x88e   :  { %3299 = vmatpush3.bf16.msra.mxu1 %v1566_v30 }
 0x88f   :  { %v3288_v29 = vpop.f32.mrb[76].mxu0  ;;  %3300 = vmatprep.subr.bf16.mxu1 %v1567_v62 }
 0x890   :  { %v1547_v32 = vpop.f32.mrb[77].mxu0 }
 0x891   :  { %v3289_v1 = vpop.f32.mrb[78].mxu0 }
 0x892   :  { %v1569_v0 = vpack.c.bf16 %v3289_v1, %v3288_v29  ;;  %v1550_v35 = vpop.f32.mrb[79].mxu0  ;;  %3301 = vmatpush3.bf16.msra.mxu1 %v1567_v62 }
 0x893   :  { %v1568_v40 = vpack.c.bf16 %v1550_v35, %v1547_v32 }
 0x895   :  { %3302 = vmatprep.subr.bf16.mxu1 %v1568_v40 }
 0x896   :  { %3303 = vmatpush3.bf16.msra.mxu1 %v1568_v40 }
 0x897   :  { %3304 = vmatprep.subr.bf16.mxu1 %v1569_v0 }
 0x89a   :  { %3305 = vmatpush3.bf16.msra.mxu1 %v1569_v0 }
 0x89d   :  { %3307 = vmatmul.mubr.bf16.vlgmr.msra.gmra.mrb[64].mxu1 %v4146_v41 }
 0x89e   :  { %3310 = vmatprep.mubr.bf16.mxu1 %v4152_v43 }
 0x8a5   :  { %3311 = vmatmul.mubr.bf16.gmra.mrb[68].mxu1 %v4158_v44 }
 0x8a6   :  { %3314 = vmatprep.mubr.bf16.mxu1 %v4164_v46 }
 0x8ad   :  { %3315 = vmatmul.mubr.bf16.gmra.mrb[72].mxu1 %v4170_v54 }
 0x8ae   :  { %3318 = vmatprep.mubr.bf16.mxu1 %v4176_v47 }
 0x8b5   :  { %3319 = vmatmul.mubr.bf16.gmra.mrb[76].mxu1 %v4182_v60 }
 0x8b6   :  { %3370 = vmatprep.mubr.bf16.mxu1 %v4188_v12 }
 0x970   :  { %v3308_v50 = vpop.f32.mrb[64].mxu1 }
 0x971   :  { %v1619_v51 = vadd.f32 %v3308_v50, %v4203_v49  ;;  %v1610_v18 = vpop.f32.mrb[65].mxu1 }
 0x972   :  { %v1611_v52 = vadd.f32 %v4203_v49, %v1610_v18  ;;  %v3309_v6 = vpop.f32.mrb[66].mxu1 }
 0x973   :  { %v1622_v53 = vadd.f32 %v3309_v6, %v4203_v49  ;;  %v1613_v7 = vpop.f32.mrb[67].mxu1  ;;  %v4215_v4 = vadd.f32 %v1619_v51, %v1077_v37 }
 0x974   :  { %v4210_v16 = vadd.f32 %v1611_v52, %v1075_v59  ;;  %v1614_v13 = vadd.f32 %v4203_v49, %v1613_v7 }
 0x975   :  { %v4219_v33 = vadd.f32 %v1622_v53, %v1078_v36  ;;  %v1691_v29 = vmax.f32 %v4215_v4, 0.0 }
 0x976   :  { %v4223_v62 = vadd.f32 %v1614_v13, %v1076_v2  ;;  %v1689_v23 = vmax.f32 %v4210_v16, 0.0 }
 0x977   :  { %v1692_v27 = vmax.f32 %v4219_v33, 0.0 }
 0x978   :  { %v1690_v59 = vmax.f32 %v4223_v62, 0.0  ;;  %v3312_v30 = vpop.f32.mrb[68].mxu1 }
 0x979   :  { %v1635_v22 = vadd.f32 %v3312_v30, %v4203_v49  ;;  %v1626_v37 = vpop.f32.mrb[69].mxu1  ;;  %v1725_v2 = vpack.c.bf16 %v1692_v27, %v1691_v29 }
 0x97a   :  { %v1627_v34 = vadd.f32 %v4203_v49, %v1626_v37  ;;  %v3313_v36 = vpop.f32.mrb[70].mxu1  ;;  %v1724_v20 = vpack.c.bf16 %v1690_v59, %v1689_v23 }
 0x97b   :  { %v1638_v32 = vadd.f32 %v3313_v36, %v4203_v49  ;;  %v1629_v1 = vpop.f32.mrb[71].mxu1  ;;  %v4247_v40 = vadd.f32 %v1635_v22, %v1081_v11 }
 0x97c   :  { %v4242_v0 = vadd.f32 %v1627_v34, %v1079_v17  ;;  %v1630_v35 = vadd.f32 %v4203_v49, %v1629_v1  ;;  %3338 = vmatprep.mubr.bf16.mxu0 %v1724_v20 }
 0x97d   :  { %v4251_v15 = vadd.f32 %v1638_v32, %v1082_v9  ;;  %3339 = vmatmul.mubr.bf16.vlgmr.msra.gmra.mrb[80].mxu0 %v1725_v2  ;;  %v1695_v57 = vmax.f32 %v4247_v40, 0.0 }
 0x97e   :  { %v4255_v14 = vadd.f32 %v1630_v35, %v1080_v63  ;;  %v1693_v17 = vmax.f32 %v4242_v0, 0.0  ;;  %3387 = vmatpush3.bf16.msra.mxu0 %v3582_v5 }
 0x97f   :  { %v1696_v10 = vmax.f32 %v4251_v15, 0.0 }
 0x980   :  { %v1694_v48 = vmax.f32 %v4255_v14, 0.0  ;;  %v3316_v50 = vpop.f32.mrb[72].mxu1 }
 0x981   :  { %v1651_v11 = vadd.f32 %v3316_v50, %v4203_v49  ;;  %v1642_v51 = vpop.f32.mrb[73].mxu1  ;;  %v1727_v52 = vpack.c.bf16 %v1696_v10, %v1695_v57 }
 0x982   :  { %v1643_v58 = vadd.f32 %v4203_v49, %v1642_v51  ;;  %v3317_v9 = vpop.f32.mrb[74].mxu1  ;;  %v1726_v42 = vpack.c.bf16 %v1694_v48, %v1693_v17  ;;  %v3586_v51 = vld [vmem:[#allocation2 + $0xa0] sm:$0xff]  }
 0x983   :  { %v1654_v63 = vadd.f32 %v3317_v9, %v4203_v49  ;;  %v1645_v18 = vpop.f32.mrb[75].mxu1  ;;  %v4279_v7 = vadd.f32 %v1651_v11, %v1085_v26 }
 0x984   :  { %v4274_v6 = vadd.f32 %v1643_v58, %v1083_v31  ;;  %v1646_v53 = vadd.f32 %v4203_v49, %v1645_v18  ;;  %3342 = vmatprep.mubr.bf16.mxu0 %v1726_v42  ;;  %v3587_v58 = vld [vmem:[#allocation2 + $0xa8] sm:$0xff]  }
 0x985   :  { %v4283_v13 = vadd.f32 %v1654_v63, %v1086_v24  ;;  %3343 = vmatmul.mubr.bf16.gmra.mrb[84].mxu0 %v1727_v52  ;;  %v1699_v21 = vmax.f32 %v4279_v7, 0.0 }
 0x986   :  { %v4287_v30 = vadd.f32 %v1646_v53, %v1084_v61  ;;  %v1697_v31 = vmax.f32 %v4274_v6, 0.0 }
 0x987   :  { %v1700_v8 = vmax.f32 %v4283_v13, 0.0 }
 0x988   :  { %v1698_v22 = vmax.f32 %v4287_v30, 0.0  ;;  %v3320_v37 = vpop.f32.mrb[76].mxu1 }
 0x989   :  { %v1667_v26 = vadd.f32 %v3320_v37, %v4203_v49  ;;  %v1658_v34 = vpop.f32.mrb[77].mxu1  ;;  %v1729_v20 = vpack.c.bf16 %v1700_v8, %v1699_v21 }
 0x98a   :  { %v1659_v25 = vadd.f32 %v4203_v49, %v1658_v34  ;;  %v3321_v24 = vpop.f32.mrb[78].mxu1  ;;  %v1728_v28 = vpack.c.bf16 %v1698_v22, %v1697_v31 }
 0x98b   :  { %v1670_v61 = vadd.f32 %v3321_v24, %v4203_v49  ;;  %v1661_v36 = vpop.f32.mrb[79].mxu1  ;;  %v4311_v1 = vadd.f32 %v1667_v26, %v1089_v19  ;;  %v3585_v19 = vld [vmem:[#allocation2 + $0x98] sm:$0xff]  }
 0x98c   :  { %v4306_v2 = vadd.f32 %v1659_v25, %v1087_v45  ;;  %v1662_v32 = vadd.f32 %v4203_v49, %v1661_v36  ;;  %3346 = vmatprep.mubr.bf16.mxu0 %v1728_v28 }
 0x98d   :  { %v4315_v35 = vadd.f32 %v1670_v61, %v1090_v38  ;;  %3347 = vmatmul.mubr.bf16.gmra.mrb[88].mxu0 %v1729_v20  ;;  %v1703_v11 = vmax.f32 %v4311_v1, 0.0  ;;  %v3583_v38 = vld [vmem:[#allocation2 + $0x88] sm:$0xff]  }
 0x98e   :  { %v4319_v50 = vadd.f32 %v1662_v32, %v1088_v56  ;;  %v1701_v45 = vmax.f32 %v4306_v2, 0.0  ;;  %3388 = vmatprep.subr.bf16.mxu0 %v3583_v38  ;;  %v3584_v56 = vld [vmem:[#allocation2 + $0x90] sm:$0xff]  }
 0x98f   :  { %v1704_v3 = vmax.f32 %v4315_v35, 0.0  ;;  %3389 = vmatpush3.bf16.msra.mxu0 %v3583_v38 }
 0x990   :  { %v1702_v49 = vmax.f32 %v4319_v50, 0.0  ;;  %3390 = vmatprep.subr.bf16.mxu0 %v3584_v56 }
 0x991   :  { %v1731_v55 = vpack.c.bf16 %v1704_v3, %v1703_v11 }
 0x992   :  { %v1730_v39 = vpack.c.bf16 %v1702_v49, %v1701_v45 }
 0x993   :  { %3391 = vmatpush3.bf16.msra.mxu0 %v3584_v56 }
 0x994   :  { %3350 = vmatprep.mubr.bf16.mxu0 %v1730_v39  ;;  %3392 = vmatprep.subr.bf16.mxu0 %v3585_v19 }
 0x995   :  { %3351 = vmatmul.mubr.bf16.gmra.mrb[92].mxu0 %v1731_v55 }
 0x997   :  { %3393 = vmatpush3.bf16.msra.mxu0 %v3585_v19 }
 0x998   :  { %3394 = vmatprep.subr.bf16.mxu0 %v3586_v51 }
 0x99b   :  { %3395 = vmatpush3.bf16.msra.mxu0 %v3586_v51 }
 0x99c   :  { %3396 = vmatprep.subr.bf16.mxu0 %v3587_v58 }
 0x99f   :  { %3397 = vmatpush3.bf16.msra.mxu0 %v3587_v58 }
 0xa50   :  { %v3340_v9 = vpop.f32.mrb[80].mxu0 }
 0xa51   :  { %v1814_v42 = vpop.f32.mrb[81].mxu0 }
 0xa52   :  { %v3341_v63 = vpop.f32.mrb[82].mxu0 }
 0xa53   :  { %v1878_v18 = vpack.c.bf16 %v3341_v63, %v3340_v9  ;;  %v1817_v52 = vpop.f32.mrb[83].mxu0  ;;  %v3588_v9 = vld [vmem:[#allocation2 + $0xb0] sm:$0xff]   ;;  %v2726_v63 = vld [vmem:[%s4468_s5 + $0x2] ss:$0 sm:$0xff] }
 0xa54   :  { %v1877_v53 = vpack.c.bf16 %v1817_v52, %v1814_v42  ;;  %3398 = vmatprep.subr.bf16.mxu0 %v3588_v9  ;;  %v3589_v42 = vld [vmem:[#allocation2 + $0xb8] sm:$0xff]  }
 0xa55   :  { %3399 = vmatpush3.bf16.msra.mxu0 %v3588_v9 }
 0xa56   :  { %3354 = vmatprep.subr.bf16.mxu1 %v1877_v53  ;;  %3400 = vmatprep.subr.bf16.mxu0 %v3589_v42 }
 0xa57   :  { %3355 = vmatpush3.bf16.msra.mxu1 %v1877_v53 }
 0xa58   :  { %v3344_v37 = vpop.f32.mrb[84].mxu0  ;;  %3356 = vmatprep.subr.bf16.mxu1 %v1878_v18 }
 0xa59   :  { %v1830_v26 = vpop.f32.mrb[85].mxu0  ;;  %3401 = vmatpush3.bf16.msra.mxu0 %v3589_v42 }
 0xa5a   :  { %v3345_v34 = vpop.f32.mrb[86].mxu0 }
 0xa5b   :  { %v1880_v25 = vpack.c.bf16 %v3345_v34, %v3344_v37  ;;  %v1833_v24 = vpop.f32.mrb[87].mxu0  ;;  %3357 = vmatpush3.bf16.msra.mxu1 %v1878_v18 }
 0xa5c   :  { %v1879_v28 = vpack.c.bf16 %v1833_v24, %v1830_v26 }
 0xa5e   :  { %3358 = vmatprep.subr.bf16.mxu1 %v1879_v28 }
 0xa5f   :  { %3359 = vmatpush3.bf16.msra.mxu1 %v1879_v28 }
 0xa60   :  { %v3348_v61 = vpop.f32.mrb[88].mxu0  ;;  %3360 = vmatprep.subr.bf16.mxu1 %v1880_v25 }
 0xa61   :  { %v1846_v36 = vpop.f32.mrb[89].mxu0 }
 0xa62   :  { %v3349_v20 = vpop.f32.mrb[90].mxu0 }
 0xa63   :  { %v1882_v32 = vpack.c.bf16 %v3349_v20, %v3348_v61  ;;  %v1849_v39 = vpop.f32.mrb[91].mxu0  ;;  %3361 = vmatpush3.bf16.msra.mxu1 %v1880_v25 }
 0xa64   :  { %v1881_v55 = vpack.c.bf16 %v1849_v39, %v1846_v36 }
 0xa66   :  { %3362 = vmatprep.subr.bf16.mxu1 %v1881_v55 }
 0xa67   :  { %3363 = vmatpush3.bf16.msra.mxu1 %v1881_v55 }
 0xa68   :  { %v3352_v5 = vpop.f32.mrb[92].mxu0  ;;  %3364 = vmatprep.subr.bf16.mxu1 %v1882_v32 }
 0xa69   :  { %v1862_v38 = vpop.f32.mrb[93].mxu0 }
 0xa6a   :  { %v3353_v56 = vpop.f32.mrb[94].mxu0 }
 0xa6b   :  { %v1884_v19 = vpack.c.bf16 %v3353_v56, %v3352_v5  ;;  %v1865_v51 = vpop.f32.mrb[95].mxu0  ;;  %3365 = vmatpush3.bf16.msra.mxu1 %v1882_v32 }
 0xa6c   :  { %v1883_v58 = vpack.c.bf16 %v1865_v51, %v1862_v38 }
 0xa6e   :  { %3366 = vmatprep.subr.bf16.mxu1 %v1883_v58 }
 0xa6f   :  { %3367 = vmatpush3.bf16.msra.mxu1 %v1883_v58 }
 0xa70   :  { %3368 = vmatprep.subr.bf16.mxu1 %v1884_v19 }
 0xa73   :  { %3369 = vmatpush3.bf16.msra.mxu1 %v1884_v19 }
 0xa76   :  { %3371 = vmatmul.mubr.bf16.vlgmr.msra.gmra.mrb[80].mxu1 %v4146_v41 }
 0xa77   :  { %3374 = vmatprep.mubr.bf16.mxu1 %v4152_v43 }
 0xa7e   :  { %3375 = vmatmul.mubr.bf16.gmra.mrb[84].mxu1 %v4158_v44 }
 0xa7f   :  { %3378 = vmatprep.mubr.bf16.mxu1 %v4164_v46 }
 0xa86   :  { %3379 = vmatmul.mubr.bf16.gmra.mrb[88].mxu1 %v4170_v54 }
 0xa87   :  { %3382 = vmatprep.mubr.bf16.mxu1 %v4176_v47 }
 0xa8e   :  { %3383 = vmatmul.mubr.bf16.gmra.mrb[92].mxu1 %v4182_v60 }
 0xa8f   :  { %3434 = vmatprep.mubr.bf16.mxu1 %v4188_v12 }
 0xb49   :  { %v3372_v18 = vpop.f32.mrb[80].mxu1 }
 0xb4a   :  { %v1934_v52 = vadd.f32 %v3372_v18, %v2726_v63  ;;  %v1925_v53 = vpop.f32.mrb[81].mxu1 }
 0xb4b   :  { %v1926_v37 = vadd.f32 %v2726_v63, %v1925_v53  ;;  %v3373_v26 = vpop.f32.mrb[82].mxu1 }
 0xb4c   :  { %v1937_v34 = vadd.f32 %v3373_v26, %v2726_v63  ;;  %v1928_v25 = vpop.f32.mrb[83].mxu1  ;;  %v1990_v28 = vmax.f32 %v1934_v52, 0.0 }
 0xb4d   :  { %v1929_v24 = vadd.f32 %v2726_v63, %v1928_v25  ;;  %v1988_v36 = vmax.f32 %v1926_v37, 0.0 }
 0xb4e   :  { %v1991_v61 = vmax.f32 %v1937_v34, 0.0 }
 0xb4f   :  { %v1989_v20 = vmax.f32 %v1929_v24, 0.0 }
 0xb50   :  { %v2024_v32 = vpack.c.bf16 %v1991_v61, %v1990_v28 }
 0xb51   :  { %v2023_v39 = vpack.c.bf16 %v1989_v20, %v1988_v36  ;;  %v3376_v55 = vpop.f32.mrb[84].mxu1 }
 0xb52   :  { %v1950_v5 = vadd.f32 %v3376_v55, %v2726_v63  ;;  %v1941_v38 = vpop.f32.mrb[85].mxu1 }
 0xb53   :  { %v1942_v56 = vadd.f32 %v2726_v63, %v1941_v38  ;;  %v3377_v19 = vpop.f32.mrb[86].mxu1  ;;  %3402 = vmatprep.mubr.bf16.mxu0 %v2023_v39 }
 0xb54   :  { %v1953_v51 = vadd.f32 %v3377_v19, %v2726_v63  ;;  %v1944_v58 = vpop.f32.mrb[87].mxu1  ;;  %3403 = vmatmul.mubr.bf16.vlgmr.msra.gmra.mrb[96].mxu0 %v2024_v32  ;;  %v1994_v42 = vmax.f32 %v1950_v5, 0.0 }
 0xb55   :  { %v1945_v9 = vadd.f32 %v2726_v63, %v1944_v58  ;;  %v1992_v53 = vmax.f32 %v1942_v56, 0.0 }
 0xb56   :  { %v1995_v18 = vmax.f32 %v1953_v51, 0.0 }
 0xb57   :  { %v1993_v26 = vmax.f32 %v1945_v9, 0.0 }
 0xb58   :  { %v2026_v52 = vpack.c.bf16 %v1995_v18, %v1994_v42 }
 0xb59   :  { %v2025_v34 = vpack.c.bf16 %v1993_v26, %v1992_v53  ;;  %v3380_v37 = vpop.f32.mrb[88].mxu1 }
 0xb5a   :  { %v1966_v25 = vadd.f32 %v3380_v37, %v2726_v63  ;;  %v1957_v24 = vpop.f32.mrb[89].mxu1 }
 0xb5b   :  { %v1958_v28 = vadd.f32 %v2726_v63, %v1957_v24  ;;  %v3381_v61 = vpop.f32.mrb[90].mxu1  ;;  %3406 = vmatprep.mubr.bf16.mxu0 %v2025_v34 }
 0xb5c   :  { %v1969_v36 = vadd.f32 %v3381_v61, %v2726_v63  ;;  %v1960_v20 = vpop.f32.mrb[91].mxu1  ;;  %3407 = vmatmul.mubr.bf16.gmra.mrb[100].mxu0 %v2026_v52  ;;  %v1998_v55 = vmax.f32 %v1966_v25, 0.0 }
 0xb5d   :  { %v1961_v39 = vadd.f32 %v2726_v63, %v1960_v20  ;;  %v1996_v32 = vmax.f32 %v1958_v28, 0.0  ;;  %v3590_v28 = vld [vmem:[#allocation4] sm:$0xff]   ;;  %v3591_v20 = vld [vmem:[#allocation4 + $0x8] sm:$0xff]  }
 0xb5e   :  { %v1999_v38 = vmax.f32 %v1969_v36, 0.0  ;;  %3450 = vmatprep.subr.bf16.mxu0 %v3590_v28 }
 0xb5f   :  { %v1997_v19 = vmax.f32 %v1961_v39, 0.0  ;;  %3451 = vmatpush3.bf16.msra.mxu0 %v3590_v28  ;;  %v3592_v39 = vld [vmem:[#allocation4 + $0x10] sm:$0xff]  }
 0xb60   :  { %v2028_v5 = vpack.c.bf16 %v1999_v38, %v1998_v55  ;;  %3452 = vmatprep.subr.bf16.mxu0 %v3591_v20  ;;  %v3593_v55 = vld [vmem:[#allocation4 + $0x18] sm:$0xff]  }
 0xb61   :  { %v2027_v51 = vpack.c.bf16 %v1997_v19, %v1996_v32  ;;  %v3384_v56 = vpop.f32.mrb[92].mxu1 }
 0xb62   :  { %v1982_v58 = vadd.f32 %v3384_v56, %v2726_v63  ;;  %v1973_v9 = vpop.f32.mrb[93].mxu1 }
 0xb63   :  { %v1974_v42 = vadd.f32 %v2726_v63, %v1973_v9  ;;  %v3385_v18 = vpop.f32.mrb[94].mxu1  ;;  %3410 = vmatprep.mubr.bf16.mxu0 %v2027_v51  ;;  %3453 = vmatpush3.bf16.msra.mxu0 %v3591_v20 }
 0xb64   :  { %v1985_v53 = vadd.f32 %v3385_v18, %v2726_v63  ;;  %v1976_v26 = vpop.f32.mrb[95].mxu1  ;;  %3411 = vmatmul.mubr.bf16.gmra.mrb[104].mxu0 %v2028_v5  ;;  %v2002_v37 = vmax.f32 %v1982_v58, 0.0  ;;  %3454 = vmatprep.subr.bf16.mxu0 %v3592_v39 }
 0xb65   :  { %v1977_v34 = vadd.f32 %v2726_v63, %v1976_v26  ;;  %v2000_v52 = vmax.f32 %v1974_v42, 0.0  ;;  %v3594_v63 = vld [vmem:[#allocation4 + $0x20] sm:$0xff]  }
 0xb66   :  { %v2003_v24 = vmax.f32 %v1985_v53, 0.0 }
 0xb67   :  { %v2001_v61 = vmax.f32 %v1977_v34, 0.0  ;;  %3455 = vmatpush3.bf16.msra.mxu0 %v3592_v39 }
 0xb68   :  { %v2030_v25 = vpack.c.bf16 %v2003_v24, %v2002_v37  ;;  %3456 = vmatprep.subr.bf16.mxu0 %v3593_v55 }
 0xb69   :  { %v2029_v36 = vpack.c.bf16 %v2001_v61, %v2000_v52 }
 0xb6b   :  { %3414 = vmatprep.mubr.bf16.mxu0 %v2029_v36  ;;  %3457 = vmatpush3.bf16.msra.mxu0 %v3593_v55 }
 0xb6c   :  { %3415 = vmatmul.mubr.bf16.gmra.mrb[108].mxu0 %v2030_v25  ;;  %3458 = vmatprep.subr.bf16.mxu0 %v3594_v63 }
 0xb6f   :  { %3459 = vmatpush3.bf16.msra.mxu0 %v3594_v63 }
 0xc27   :  { %v3404_v38 = vpop.f32.mrb[96].mxu0 }
 0xc28   :  { %v2113_v32 = vpop.f32.mrb[97].mxu0 }
 0xc29   :  { %v3405_v19 = vpop.f32.mrb[98].mxu0 }
 0xc2a   :  { %v2177_v5 = vpack.c.bf16 %v3405_v19, %v3404_v38  ;;  %v2116_v51 = vpop.f32.mrb[99].mxu0  ;;  %v3595_v38 = vld [vmem:[#allocation4 + $0x28] sm:$0xff]   ;;  %v3597_v19 = vld [vmem:[#allocation4 + $0x38] sm:$0xff]  }
 0xc2b   :  { %v2176_v56 = vpack.c.bf16 %v2116_v51, %v2113_v32  ;;  %3460 = vmatprep.subr.bf16.mxu0 %v3595_v38  ;;  %v3596_v32 = vld [vmem:[#allocation4 + $0x30] sm:$0xff]  }
 0xc2c   :  { %3461 = vmatpush3.bf16.msra.mxu0 %v3595_v38 }
 0xc2d   :  { %3418 = vmatprep.subr.bf16.mxu1 %v2176_v56  ;;  %3462 = vmatprep.subr.bf16.mxu0 %v3596_v32 }
 0xc2e   :  { %3419 = vmatpush3.bf16.msra.mxu1 %v2176_v56 }
 0xc2f   :  { %v3408_v58 = vpop.f32.mrb[100].mxu0  ;;  %3420 = vmatprep.subr.bf16.mxu1 %v2177_v5 }
 0xc30   :  { %v2129_v9 = vpop.f32.mrb[101].mxu0  ;;  %3463 = vmatpush3.bf16.msra.mxu0 %v3596_v32 }
 0xc31   :  { %v3409_v42 = vpop.f32.mrb[102].mxu0  ;;  %3464 = vmatprep.subr.bf16.mxu0 %v3597_v19 }
 0xc32   :  { %v2179_v18 = vpack.c.bf16 %v3409_v42, %v3408_v58  ;;  %v2132_v53 = vpop.f32.mrb[103].mxu0  ;;  %3421 = vmatpush3.bf16.msra.mxu1 %v2177_v5  ;;  %v4355_v5 = vld [vmem:[%s4470_s7 + $0x2] ss:$0 sm:$0xff] }
 0xc33   :  { %v2178_v26 = vpack.c.bf16 %v2132_v53, %v2129_v9 }
 0xc34   :  { %3465 = vmatpush3.bf16.msra.mxu0 %v3597_v19 }
 0xc35   :  { %3422 = vmatprep.subr.bf16.mxu1 %v2178_v26 }
 0xc36   :  { %3423 = vmatpush3.bf16.msra.mxu1 %v2178_v26 }
 0xc37   :  { %v3412_v34 = vpop.f32.mrb[104].mxu0  ;;  %3424 = vmatprep.subr.bf16.mxu1 %v2179_v18 }
 0xc38   :  { %v2145_v37 = vpop.f32.mrb[105].mxu0 }
 0xc39   :  { %v3413_v24 = vpop.f32.mrb[106].mxu0 }
 0xc3a   :  { %v2181_v52 = vpack.c.bf16 %v3413_v24, %v3412_v34  ;;  %v2148_v61 = vpop.f32.mrb[107].mxu0  ;;  %3425 = vmatpush3.bf16.msra.mxu1 %v2179_v18 }
 0xc3b   :  { %v2180_v25 = vpack.c.bf16 %v2148_v61, %v2145_v37 }
 0xc3d   :  { %3426 = vmatprep.subr.bf16.mxu1 %v2180_v25 }
 0xc3e   :  { %3427 = vmatpush3.bf16.msra.mxu1 %v2180_v25 }
 0xc3f   :  { %v3416_v36 = vpop.f32.mrb[108].mxu0  ;;  %3428 = vmatprep.subr.bf16.mxu1 %v2181_v52 }
 0xc40   :  { %v2161_v28 = vpop.f32.mrb[109].mxu0 }
 0xc41   :  { %v3417_v20 = vpop.f32.mrb[110].mxu0 }
 0xc42   :  { %v2183_v39 = vpack.c.bf16 %v3417_v20, %v3416_v36  ;;  %v2164_v55 = vpop.f32.mrb[111].mxu0  ;;  %3429 = vmatpush3.bf16.msra.mxu1 %v2181_v52 }
 0xc43   :  { %v2182_v63 = vpack.c.bf16 %v2164_v55, %v2161_v28 }
 0xc45   :  { %3430 = vmatprep.subr.bf16.mxu1 %v2182_v63 }
 0xc46   :  { %3431 = vmatpush3.bf16.msra.mxu1 %v2182_v63 }
 0xc47   :  { %3432 = vmatprep.subr.bf16.mxu1 %v2183_v39 }
 0xc4a   :  { %3433 = vmatpush3.bf16.msra.mxu1 %v2183_v39 }
 0xc4d   :  { %3435 = vmatmul.mubr.bf16.vlgmr.msra.gmra.mrb[96].mxu1 %v4146_v41 }
 0xc4e   :  { %3438 = vmatprep.mubr.bf16.mxu1 %v4152_v43 }
 0xc55   :  { %3439 = vmatmul.mubr.bf16.gmra.mrb[100].mxu1 %v4158_v44 }
 0xc56   :  { %3442 = vmatprep.mubr.bf16.mxu1 %v4164_v46 }
 0xc5d   :  { %3443 = vmatmul.mubr.bf16.gmra.mrb[104].mxu1 %v4170_v54 }
 0xc5e   :  { %3446 = vmatprep.mubr.bf16.mxu1 %v4176_v47 }
 0xc65   :  { %3447 = vmatmul.mubr.bf16.gmra.mrb[108].mxu1 %v4182_v60 }
 0xc66   :  { %3498 = vmatprep.mubr.bf16.mxu1 %v4188_v12 }
 0xd20   :  { %v3436_v51 = vpop.f32.mrb[96].mxu1 }
 0xd21   :  { %v2233_v56 = vadd.f32 %v3436_v51, %v4355_v5  ;;  %v2224_v58 = vpop.f32.mrb[97].mxu1 }
 0xd22   :  { %v2225_v12 = vadd.f32 %v4355_v5, %v2224_v58  ;;  %v3437_v9 = vpop.f32.mrb[98].mxu1 }
 0xd23   :  { %v2289_v42 = vadd.f32 %v2233_v56, %v1691_v29  ;;  %v2236_v18 = vadd.f32 %v3437_v9, %v4355_v5  ;;  %v2227_v53 = vpop.f32.mrb[99].mxu1 }
 0xd24   :  { %v2287_v26 = vadd.f32 %v2225_v12, %v1689_v23  ;;  %v2228_v34 = vadd.f32 %v4355_v5, %v2227_v53 }
 0xd25   :  { %v2290_v37 = vadd.f32 %v2236_v18, %v1692_v27  ;;  %v2305_v52 = vmax.f32 %v2289_v42, 0.0 }
 0xd26   :  { %v2288_v24 = vadd.f32 %v2228_v34, %v1690_v59  ;;  %v2303_v25 = vmax.f32 %v2287_v26, 0.0 }
 0xd27   :  { %v2306_v61 = vmax.f32 %v2290_v37, 0.0 }
 0xd28   :  { %v2304_v36 = vmax.f32 %v2288_v24, 0.0  ;;  %v3440_v4 = vpop.f32.mrb[100].mxu1 }
 0xd29   :  { %v2337_v29 = vpack.c.bf16 %v2306_v61, %v2305_v52  ;;  %v2249_v28 = vadd.f32 %v3440_v4, %v4355_v5  ;;  %v2240_v20 = vpop.f32.mrb[101].mxu1 }
 0xd2a   :  { %v2241_v16 = vadd.f32 %v4355_v5, %v2240_v20  ;;  %v3441_v23 = vpop.f32.mrb[102].mxu1  ;;  %v2336_v39 = vpack.c.bf16 %v2304_v36, %v2303_v25 }
 0xd2b   :  { %v2293_v33 = vadd.f32 %v2249_v28, %v1695_v57  ;;  %v2252_v27 = vadd.f32 %v3441_v23, %v4355_v5  ;;  %v2243_v62 = vpop.f32.mrb[103].mxu1 }
 0xd2c   :  { %v2291_v59 = vadd.f32 %v2241_v16, %v1693_v17  ;;  %v2244_v55 = vadd.f32 %v4355_v5, %v2243_v62  ;;  %3466 = vmatprep.mubr.bf16.mxu0 %v2336_v39 }
 0xd2d   :  { %v2294_v63 = vadd.f32 %v2252_v27, %v1696_v10  ;;  %3467 = vmatmul.mubr.bf16.vlgmr.msra.gmra.mrb[112].mxu0 %v2337_v29  ;;  %v2309_v32 = vmax.f32 %v2293_v33, 0.0 }
 0xd2e   :  { %v2292_v38 = vadd.f32 %v2244_v55, %v1694_v48  ;;  %v2307_v40 = vmax.f32 %v2291_v59, 0.0 }
 0xd2f   :  { %v2310_v19 = vmax.f32 %v2294_v63, 0.0 }
 0xd30   :  { %v2308_v57 = vmax.f32 %v2292_v38, 0.0  ;;  %v3444_v51 = vpop.f32.mrb[104].mxu1 }
 0xd31   :  { %v2265_v56 = vadd.f32 %v3444_v51, %v4355_v5  ;;  %v2256_v58 = vpop.f32.mrb[105].mxu1  ;;  %v2339_v0 = vpack.c.bf16 %v2310_v19, %v2309_v32 }
 0xd32   :  { %v2257_v17 = vadd.f32 %v4355_v5, %v2256_v58  ;;  %v3445_v12 = vpop.f32.mrb[106].mxu1  ;;  %v2338_v9 = vpack.c.bf16 %v2308_v57, %v2307_v40 }
 0xd33   :  { %v2297_v15 = vadd.f32 %v2265_v56, %v1699_v21  ;;  %v2268_v10 = vadd.f32 %v3445_v12, %v4355_v5  ;;  %v2259_v14 = vpop.f32.mrb[107].mxu1  ;;  %v2745_v12 = vld [vmem:[%s4472_s9] ss:$0 sm:$0xff] }
 0xd34   :  { %v2295_v48 = vadd.f32 %v2257_v17, %v1697_v31  ;;  %v2260_v42 = vadd.f32 %v4355_v5, %v2259_v14  ;;  %3470 = vmatprep.mubr.bf16.mxu0 %v2338_v9 }
 0xd35   :  { %v2298_v18 = vadd.f32 %v2268_v10, %v1700_v8  ;;  %3471 = vmatmul.mubr.bf16.gmra.mrb[116].mxu0 %v2339_v0  ;;  %v2313_v26 = vmax.f32 %v2297_v15, 0.0 }
 0xd36   :  { %v2296_v53 = vadd.f32 %v2260_v42, %v1698_v22  ;;  %v2311_v7 = vmax.f32 %v2295_v48, 0.0 }
 0xd37   :  { %v2314_v34 = vmax.f32 %v2298_v18, 0.0 }
 0xd38   :  { %v2312_v21 = vmax.f32 %v2296_v53, 0.0  ;;  %v3448_v37 = vpop.f32.mrb[108].mxu1 }
 0xd39   :  { %v2281_v24 = vadd.f32 %v3448_v37, %v4355_v5  ;;  %v2272_v52 = vpop.f32.mrb[109].mxu1  ;;  %v2341_v6 = vpack.c.bf16 %v2314_v34, %v2313_v26 }
 0xd3a   :  { %v2273_v31 = vadd.f32 %v4355_v5, %v2272_v52  ;;  %v3449_v61 = vpop.f32.mrb[110].mxu1  ;;  %v2340_v25 = vpack.c.bf16 %v2312_v21, %v2311_v7 }
 0xd3b   :  { %v2301_v13 = vadd.f32 %v2281_v24, %v1703_v11  ;;  %v2284_v8 = vadd.f32 %v3449_v61, %v4355_v5  ;;  %v2275_v30 = vpop.f32.mrb[111].mxu1 }
 0xd3c   :  { %v2299_v22 = vadd.f32 %v2273_v31, %v1701_v45  ;;  %v2276_v36 = vadd.f32 %v4355_v5, %v2275_v30  ;;  %3474 = vmatprep.mubr.bf16.mxu0 %v2340_v25 }
 0xd3d   :  { %v2302_v4 = vadd.f32 %v2284_v8, %v1704_v3  ;;  %3475 = vmatmul.mubr.bf16.gmra.mrb[120].mxu0 %v2341_v6  ;;  %v2317_v28 = vmax.f32 %v2301_v13, 0.0 }
 0xd3e   :  { %v2300_v29 = vadd.f32 %v2276_v36, %v1702_v49  ;;  %v2315_v1 = vmax.f32 %v2299_v22, 0.0 }
 0xd3f   :  { %v2318_v20 = vmax.f32 %v2302_v4, 0.0 }
 0xd40   :  { %v2316_v11 = vmax.f32 %v2300_v29, 0.0 }
 0xd41   :  { %v2343_v16 = vpack.c.bf16 %v2318_v20, %v2317_v28 }
 0xd42   :  { %v2342_v23 = vpack.c.bf16 %v2316_v11, %v2315_v1 }
 0xd44   :  { %3478 = vmatprep.mubr.bf16.mxu0 %v2342_v23 }
 0xd45   :  { %3479 = vmatmul.mubr.bf16.gmra.mrb[124].mxu0 %v2343_v16 }
 0xe00   :  { %v3468_v2 = vpop.f32.mrb[112].mxu0 }
 0xe01   :  { %v2426_v45 = vpop.f32.mrb[113].mxu0 }
 0xe02   :  { %v3469_v39 = vpop.f32.mrb[114].mxu0 }
 0xe03   :  { %v2490_v5 = vpack.c.bf16 %v3469_v39, %v3468_v2  ;;  %v2429_v33 = vpop.f32.mrb[115].mxu0 }
 0xe04   :  { %v2489_v27 = vpack.c.bf16 %v2429_v33, %v2426_v45 }
 0xe06   :  { %3482 = vmatprep.subr.bf16.mxu1 %v2489_v27 }
 0xe07   :  { %3483 = vmatpush3.bf16.msra.mxu1 %v2489_v27 }
 0xe08   :  { %v3472_v35 = vpop.f32.mrb[116].mxu0  ;;  %3484 = vmatprep.subr.bf16.mxu1 %v2490_v5 }
 0xe09   :  { %v2442_v50 = vpop.f32.mrb[117].mxu0 }
 0xe0a   :  { %v3473_v3 = vpop.f32.mrb[118].mxu0 }
 0xe0b   :  { %v2492_v49 = vpack.c.bf16 %v3473_v3, %v3472_v35  ;;  %v2445_v62 = vpop.f32.mrb[119].mxu0  ;;  %3485 = vmatpush3.bf16.msra.mxu1 %v2490_v5 }
 0xe0c   :  { %v2491_v59 = vpack.c.bf16 %v2445_v62, %v2442_v50 }
 0xe0e   :  { %3486 = vmatprep.subr.bf16.mxu1 %v2491_v59 }
 0xe0f   :  { %3487 = vmatpush3.bf16.msra.mxu1 %v2491_v59 }
 0xe10   :  { %v3476_v55 = vpop.f32.mrb[120].mxu0  ;;  %3488 = vmatprep.subr.bf16.mxu1 %v2492_v49 }
 0xe11   :  { %v2458_v63 = vpop.f32.mrb[121].mxu0 }
 0xe12   :  { %v3477_v38 = vpop.f32.mrb[122].mxu0 }
 0xe13   :  { %v2494_v32 = vpack.c.bf16 %v3477_v38, %v3476_v55  ;;  %v2461_v19 = vpop.f32.mrb[123].mxu0  ;;  %3489 = vmatpush3.bf16.msra.mxu1 %v2492_v49 }
 0xe14   :  { %v2493_v40 = vpack.c.bf16 %v2461_v19, %v2458_v63 }
 0xe16   :  { %3490 = vmatprep.subr.bf16.mxu1 %v2493_v40 }
 0xe17   :  { %3491 = vmatpush3.bf16.msra.mxu1 %v2493_v40 }
 0xe18   :  { %v3480_v57 = vpop.f32.mrb[124].mxu0  ;;  %3492 = vmatprep.subr.bf16.mxu1 %v2494_v32 }
 0xe19   :  { %v2474_v51 = vpop.f32.mrb[125].mxu0 }
 0xe1a   :  { %v3481_v56 = vpop.f32.mrb[126].mxu0 }
 0xe1b   :  { %v2496_v58 = vpack.c.bf16 %v3481_v56, %v3480_v57  ;;  %v2477_v0 = vpop.f32.mrb[127].mxu0  ;;  %3493 = vmatpush3.bf16.msra.mxu1 %v2494_v32 }
 0xe1c   :  { %v2495_v17 = vpack.c.bf16 %v2477_v0, %v2474_v51 }
 0xe1e   :  { %3494 = vmatprep.subr.bf16.mxu1 %v2495_v17 }
 0xe1f   :  { %3495 = vmatpush3.bf16.msra.mxu1 %v2495_v17 }
 0xe20   :  { %3496 = vmatprep.subr.bf16.mxu1 %v2496_v58 }
 0xe23   :  { %3497 = vmatpush3.bf16.msra.mxu1 %v2496_v58 }
 0xe26   :  { %3499 = vmatmul.mubr.bf16.vlgmr.msra.gmra.mrb[112].mxu1 %v4146_v41 }
 0xe27   :  { %3502 = vmatprep.mubr.bf16.mxu1 %v4152_v43 }
 0xe2e   :  { %3503 = vmatmul.mubr.bf16.gmra.mrb[116].mxu1 %v4158_v44 }
 0xe2f   :  { %3506 = vmatprep.mubr.bf16.mxu1 %v4164_v46 }
 0xe36   :  { %3507 = vmatmul.mubr.bf16.gmra.mrb[120].mxu1 %v4170_v54 }
 0xe37   :  { %3510 = vmatprep.mubr.bf16.mxu1 %v4176_v47 }
 0xe3e   :  { %3511 = vmatmul.mubr.bf16.gmra.mrb[124].mxu1 %v4182_v60 }
 0xef9   :  { %v3500_v9 = vpop.f32.mrb[112].mxu1 }
 0xefa   :  { %v2546_v15 = vadd.f32 %v3500_v9, %v2745_v12  ;;  %v2537_v10 = vpop.f32.mrb[113].mxu1 }
 0xefb   :  { %v2538_v41 = vadd.f32 %v2745_v12, %v2537_v10  ;;  %v3501_v14 = vpop.f32.mrb[114].mxu1 }
 0xefc   :  { %2602 = vst [vmem:[%s4473_s10 + $0x10] sm:$0xff] %v2546_v15  ;;  %v2549_v43 = vadd.f32 %v3501_v14, %v2745_v12  ;;  %v2540_v44 = vpop.f32.mrb[115].mxu1 }
 0xefd   :  { %2600 = vst [vmem:[%s4473_s10] sm:$0xff] %v2538_v41  ;;  %v2541_v46 = vadd.f32 %v2745_v12, %v2540_v44 }
 0xefe   :  { %2603 = vst [vmem:[%s4473_s10 + $0x18] sm:$0xff] %v2549_v43 }
 0xeff   :  { %2601 = vst [vmem:[%s4473_s10 + $0x8] sm:$0xff] %v2541_v46 }
 0xf01   :  { %v3504_v54 = vpop.f32.mrb[116].mxu1 }
 0xf02   :  { %v2562_v47 = vadd.f32 %v3504_v54, %v2745_v12  ;;  %v2553_v60 = vpop.f32.mrb[117].mxu1 }
 0xf03   :  { %v2554_v48 = vadd.f32 %v2745_v12, %v2553_v60  ;;  %v3505_v42 = vpop.f32.mrb[118].mxu1 }
 0xf04   :  { %2606 = vst [vmem:[%s4473_s10 + $0x30] sm:$0xff] %v2562_v47  ;;  %v2565_v18 = vadd.f32 %v3505_v42, %v2745_v12  ;;  %v2556_v53 = vpop.f32.mrb[119].mxu1 }
 0xf05   :  { %2604 = vst [vmem:[%s4473_s10 + $0x20] sm:$0xff] %v2554_v48  ;;  %v2557_v26 = vadd.f32 %v2745_v12, %v2556_v53 }
 0xf06   :  { %2607 = vst [vmem:[%s4473_s10 + $0x38] sm:$0xff] %v2565_v18 }
 0xf07   :  { %2605 = vst [vmem:[%s4473_s10 + $0x28] sm:$0xff] %v2557_v26 }
 0xf09   :  { %v3508_v34 = vpop.f32.mrb[120].mxu1 }
 0xf0a   :  { %v2578_v7 = vadd.f32 %v3508_v34, %v2745_v12  ;;  %v2569_v21 = vpop.f32.mrb[121].mxu1 }
 0xf0b   :  { %v2570_v37 = vadd.f32 %v2745_v12, %v2569_v21  ;;  %v3509_v24 = vpop.f32.mrb[122].mxu1 }
 0xf0c   :  { %2610 = vst [vmem:[%s4473_s10 + $0x50] sm:$0xff] %v2578_v7  ;;  %v2581_v52 = vadd.f32 %v3509_v24, %v2745_v12  ;;  %v2572_v6 = vpop.f32.mrb[123].mxu1 }
 0xf0d   :  { %2608 = vst [vmem:[%s4473_s10 + $0x40] sm:$0xff] %v2570_v37  ;;  %v2573_v31 = vadd.f32 %v2745_v12, %v2572_v6 }
 0xf0e   :  { %2611 = vst [vmem:[%s4473_s10 + $0x58] sm:$0xff] %v2581_v52 }
 0xf0f   :  { %2609 = vst [vmem:[%s4473_s10 + $0x48] sm:$0xff] %v2573_v31 }
 0xf11   :  { %v3512_v61 = vpop.f32.mrb[124].mxu1 }
 0xf12   :  { %v2594_v25 = vadd.f32 %v3512_v61, %v2745_v12  ;;  %v2585_v13 = vpop.f32.mrb[125].mxu1 }
 0xf13   :  { %v2586_v8 = vadd.f32 %v2745_v12, %v2585_v13  ;;  %v3513_v30 = vpop.f32.mrb[126].mxu1 }
 0xf14   :  { %2614 = vst [vmem:[%s4473_s10 + $0x70] sm:$0xff] %v2594_v25  ;;  %v2597_v22 = vadd.f32 %v3513_v30, %v2745_v12  ;;  %v2588_v36 = vpop.f32.mrb[127].mxu1 }
 0xf15   :  { %2612 = vst [vmem:[%s4473_s10 + $0x60] sm:$0xff] %v2586_v8  ;;  %v2589_v4 = vadd.f32 %v2745_v12, %v2588_v36 }
 0xf16   :  { %2615 = vst [vmem:[%s4473_s10 + $0x78] sm:$0xff] %v2597_v22 }
 0xf17   :  { %2613 = vst [vmem:[%s4473_s10 + $0x68] sm:$0xff] %v2589_v4 }
 0xf18   :  { %2620 = vsyncpa [#allocation3], 1 }
 0xf19   :  { %2621 = vsyncpa [#allocation5], 1 }

</bundles_post_ra>
